<compile_context>
chip_gen: v7x
topology: tpu7x:2x2x1
jax: 0.10.0
libtpu: 0.0.40
codegen_flags: <defaults>
</compile_context>

<pallas_src>
import functools
import math

import jax
import jax.numpy as jnp
from jax import lax
from jax.experimental import pallas as pl
from jax.experimental.pallas import tpu as pltpu

_INV_SQRT2 = 1.0 / math.sqrt(2.0)


def _round_up(x, m):
    return ((x + m - 1) // m) * m


def _gelu_exact(x):
    # exact GELU (nn.GELU() default): 0.5 * x * (1 + erf(x / sqrt(2)))
    return 0.5 * x * (1.0 + lax.erf(x * _INV_SQRT2))


def _mlp_fused_kernel(x_ref, *refs, n_layers):
    """All MLP layers on one (tm, Kpad0) activation tile; activations stay in VMEM."""
    o_ref = refs[-1]
    wb = refs[:-1]                                        # (w0, b0, w1, b1, ...)
    h = x_ref[...]                                        # (tm, Kpad0) bf16
    for li in range(n_layers):                            # static, small layer count
        w_ref = wb[2 * li]
        b_ref = wb[2 * li + 1]
        acc = jnp.dot(h, w_ref[...], preferred_element_type=jnp.float32)
        acc = acc + b_ref[...]                            # (tm, Npad) + (1, Npad), f32
        if li != n_layers - 1:
            # Padding exactness: weight/bias padding is 0 and GELU(0) == 0,
            # so padded lanes stay exactly 0 through every layer.
            acc = _gelu_exact(acc)
            # Dropout(p): identity in inference / eval mode.
            h = acc.astype(jnp.bfloat16)                  # bf16 MXU input for next layer
        else:
            # Final layer: lane-dense (tm, Npad_out) store, Npad_out >= 128 multiple.
            o_ref[...] = acc.astype(o_ref.dtype)


def _vmem_budget_bytes():
    """Per-core VMEM budget with ~15% headroom for compiler-internal scratch."""
    cap = 64 * 1024 * 1024                                # safe default (v7x-sized)
    try:
        info = pltpu.get_tpu_info()
        cap = int(getattr(info, "vmem_capacity_bytes", cap))
    except Exception:
        pass
    return int(cap * 0.85)


def mlp_fused_pallas(x2d, packed, kpads, npads, out_features, out_dtype=None):
    """Run the whole MLP on x2d:(M, in_features).

    packed: flat list [w0_pad(bf16, Kpad0 x Npad0), b0_pad(f32, 1 x Npad0), w1_pad, b1_pad, ...]
    kpads/npads: per-layer padded input/output feature widths (multiples of 128).
    """
    M, in_features = x2d.shape
    L = len(kpads)
    kpad0 = kpads[0]
    npad_out = npads[-1]
    out_dtype = out_dtype or x2d.dtype
    out_itemsize = jnp.dtype(out_dtype).itemsize

    vmem_budget = _vmem_budget_bytes()
    w_bytes = sum(k * n * 2 + n * 4 for k, n in zip(kpads, npads))  # bf16 W + f32 b
    max_npad = max(npads)

    def vmem_estimate(tm_try, w_bufs):
        x_bytes = 2 * tm_try * kpad0 * 2                  # double-buffered bf16 input tile
        o_bytes = 2 * tm_try * npad_out * out_itemsize    # double-buffered output tile
        tmp_bytes = 3 * tm_try * max_npad * 4             # unrolled f32 acc / GELU temps
        return w_bufs * w_bytes + x_bytes + o_bytes + tmp_bytes + (4 << 20)

    # Pick the largest M-tile that fits the VMEM budget. For large M, cap the tile
    # so there are >=2 grid steps (keeps both TensorCores busy on dual-core chips).
    M16 = _round_up(M, 16)                                # bf16 sublane granularity
    two_tile_cap = max(_round_up((M16 + 1) // 2, 16), 128)
    tm_eff = min(128, M16)                                # last-resort fallback
    for tm_try in (1024, 512, 256, 128):
        cand = min(tm_try, M16, two_tile_cap)
        if vmem_estimate(cand, 1) <= vmem_budget:
            tm_eff = cand
            break
    M_pad = _round_up(M, tm_eff)

    # Input: bf16 cast always needed; pad only if not already aligned.
    x_b = x2d.astype(jnp.bfloat16)
    if M_pad != M or kpad0 != in_features:
        x_b = jnp.pad(x_b, ((0, M_pad - M), (0, kpad0 - in_features)))

    grid = (M_pad // tm_eff,)

    def build_and_call(single_buffer_weights):
        in_specs = [pl.BlockSpec((tm_eff, kpad0), lambda i: (i, 0))]  # activation tile
        for k, n in zip(kpads, npads):
            if single_buffer_weights:
                # Constant index_map -> fetched once, stays resident; single buffer
                # halves the resident weight footprint vs default double-buffering.
                in_specs.append(pl.BlockSpec((k, n), lambda i: (0, 0),
                                             pipeline_mode=pl.Buffered(1)))
                in_specs.append(pl.BlockSpec((1, n), lambda i: (0, 0),
                                             pipeline_mode=pl.Buffered(1)))
            else:
                in_specs.append(pl.BlockSpec((k, n), lambda i: (0, 0)))
                in_specs.append(pl.BlockSpec((1, n), lambda i: (0, 0)))

        return pl.pallas_call(
            functools.partial(_mlp_fused_kernel, n_layers=L),
            out_shape=jax.ShapeDtypeStruct((M_pad, npad_out), out_dtype),
            grid_spec=pltpu.PrefetchScalarGridSpec(
                num_scalar_prefetch=0,
                grid=grid,
                in_specs=in_specs,
                out_specs=pl.BlockSpec((tm_eff, npad_out), lambda i: (i, 0)),
            ),
            compiler_params=pltpu.CompilerParams(
                dimension_semantics=("parallel",),        # shards M-tiles across TCs
                vmem_limit_bytes=vmem_budget,
            ),
        )(x_b, *packed)

    try:
        out = build_and_call(True)                        # single-buffered resident weights
    except Exception:
        out = build_and_call(False)                       # fallback: default buffering

    return out[:M, :out_features]


class MLPPallas:
    """JAX/Pallas port of the PyTorch MLP module (inference forward, fused kernel)."""

    def __init__(self, in_features, hidden_layers_dims, out_features,
                 dropout_rate, key):
        self.dropout_rate = dropout_rate                  # identity at inference
        self.out_features = out_features
        dims = [in_features] + list(hidden_layers_dims) + [out_features]
        self.dims = dims
        self.params = []
        for d_in, d_out in zip(dims[:-1], dims[1:]):
            key, wk, bk = jax.random.split(key, 3)
            bound = 1.0 / math.sqrt(d_in)                 # torch Linear init range
            w = jax.random.uniform(wk, (d_in, d_out), jnp.float32, -bound, bound)
            b = jax.random.uniform(bk, (d_out,), jnp.float32, -bound, bound)
            self.params.append((w, b))

        # Prepack once: per-layer zero-padding to 128 multiples + bf16 weight cast.
        self.kpads = [_round_up(d, 128) for d in dims[:-1]]
        self.npads = [_round_up(d, 128) for d in dims[1:]]
        self.packed = []
        for (w, b), kp, npd in zip(self.params, self.kpads, self.npads):
            wp = jnp.pad(w, ((0, kp - w.shape[0]), (0, npd - w.shape[1]))).astype(jnp.bfloat16)
            bp = jnp.pad(b, (0, npd - b.shape[0])).reshape(1, npd).astype(jnp.float32)
            self.packed.append(wp)
            self.packed.append(bp)

    def __call__(self, x):
        batch_shape = x.shape[:-1]
        h2d = x.reshape(-1, x.shape[-1])
        y = mlp_fused_pallas(h2d, self.packed, self.kpads, self.npads,
                             out_features=self.out_features, out_dtype=x.dtype)
        return y.reshape(*batch_shape, self.out_features)


def reference_forward_bf16(mlp, x):
    """Pure-JAX reference with the same bf16-in / f32-accumulate numerics as the kernel."""
    batch_shape = x.shape[:-1]
    h = x.reshape(-1, x.shape[-1]).astype(jnp.bfloat16)
    n_layers = len(mlp.params)
    for li, (w, b) in enumerate(mlp.params):
        acc = jnp.dot(h, w.astype(jnp.bfloat16),
                      preferred_element_type=jnp.float32) + b
        if li != n_layers - 1:
            acc = _gelu_exact(acc)
            h = acc.astype(jnp.bfloat16)
        else:
            h = acc
    return h.reshape(*batch_shape, h.shape[-1])


def reference_forward_f32(mlp, x):
    """Full-f32 reference matching the PyTorch module's numerics (eval mode)."""
    batch_shape = x.shape[:-1]
    h = x.reshape(-1, x.shape[-1]).astype(jnp.float32)
    n_layers = len(mlp.params)
    for li, (w, b) in enumerate(mlp.params):
        h = jnp.dot(h, w) + b
        if li != n_layers - 1:
            h = _gelu_exact(h)
    return h.reshape(*batch_shape, h.shape[-1])


if __name__ == "__main__":
    key = jax.random.PRNGKey(0)
    key, xk, pk = jax.random.split(key, 3)

    batch, seq = 2, 8
    in_features = 32
    hidden_layers_dims = [64, 64, 64, 64]   # "5-layer MLP": 4 hidden + 1 output linear
    out_features = 32
    dropout_rate = 0.1

    x = jax.random.normal(xk, (batch, seq, in_features), jnp.float32)

    mlp = MLPPallas(in_features, hidden_layers_dims, out_features,
                    dropout_rate, pk)

    y = mlp(x)
    y = jax.block_until_ready(y)
    assert y.shape == (batch, seq, out_features)

    # Tight check vs. a reference with identical bf16/f32 mixed numerics.
    y_bf16_ref = reference_forward_bf16(mlp, x)
    err_bf16 = float(jnp.max(jnp.abs(y - y_bf16_ref)))
    assert jnp.allclose(y, y_bf16_ref, atol=1e-2, rtol=1e-2), err_bf16

    # Looser check vs. the full-f32 (PyTorch-equivalent) reference.
    y_f32_ref = reference_forward_f32(mlp, x)
    err_f32 = float(jnp.max(jnp.abs(y - y_f32_ref)))
    assert jnp.allclose(y, y_f32_ref, atol=5e-2, rtol=5e-2), err_f32

    print("KERNEL_OK")
</pallas_src>

<mosaic_0001>
module attributes {stable_mosaic.version = 11 : i64} {
  func.func @_mlp_fused_kernel(%arg0: i32, %arg1: memref<16x128xbf16, #tpu.memory_space<vmem>>, %arg2: memref<128x128xbf16, #tpu.memory_space<vmem>>, %arg3: memref<1x128xf32, #tpu.memory_space<vmem>>, %arg4: memref<128x128xbf16, #tpu.memory_space<vmem>>, %arg5: memref<1x128xf32, #tpu.memory_space<vmem>>, %arg6: memref<128x128xbf16, #tpu.memory_space<vmem>>, %arg7: memref<1x128xf32, #tpu.memory_space<vmem>>, %arg8: memref<128x128xbf16, #tpu.memory_space<vmem>>, %arg9: memref<1x128xf32, #tpu.memory_space<vmem>>, %arg10: memref<128x128xbf16, #tpu.memory_space<vmem>>, %arg11: memref<1x128xf32, #tpu.memory_space<vmem>>, %arg12: memref<16x128xf32, #tpu.memory_space<vmem>>) attributes {dimension_semantics = [#tpu.dimension_semantics<parallel>], iteration_bounds = array<i64: 1>, scalar_prefetch = 0 : i64, scratch_operands = 0 : i64, tpu.core_type = #tpu.core_type<tc>, window_params = [{transform_indices = @transform_0, window_bounds = array<i64: 16, 128>}, {pipeline_mode = #tpu.pipeline_mode<synchronous>, transform_indices = @transform_1, window_bounds = array<i64: 128, 128>}, {pipeline_mode = #tpu.pipeline_mode<synchronous>, transform_indices = @transform_2, window_bounds = array<i64: 1, 128>}, {pipeline_mode = #tpu.pipeline_mode<synchronous>, transform_indices = @transform_3, window_bounds = array<i64: 128, 128>}, {pipeline_mode = #tpu.pipeline_mode<synchronous>, transform_indices = @transform_4, window_bounds = array<i64: 1, 128>}, {pipeline_mode = #tpu.pipeline_mode<synchronous>, transform_indices = @transform_5, window_bounds = array<i64: 128, 128>}, {pipeline_mode = #tpu.pipeline_mode<synchronous>, transform_indices = @transform_6, window_bounds = array<i64: 1, 128>}, {pipeline_mode = #tpu.pipeline_mode<synchronous>, transform_indices = @transform_7, window_bounds = array<i64: 128, 128>}, {pipeline_mode = #tpu.pipeline_mode<synchronous>, transform_indices = @transform_8, window_bounds = array<i64: 1, 128>}, {pipeline_mode = #tpu.pipeline_mode<synchronous>, transform_indices = @transform_9, window_bounds = array<i64: 128, 128>}, {pipeline_mode = #tpu.pipeline_mode<synchronous>, transform_indices = @transform_10, window_bounds = array<i64: 1, 128>}, {transform_indices = @transform_11, window_bounds = array<i64: 16, 128>}]} {
    %c0 = arith.constant 0 : index
    %c0_0 = arith.constant 0 : index
    %0 = vector.load %arg1[%c0, %c0_0] : memref<16x128xbf16, #tpu.memory_space<vmem>>, vector<16x128xbf16>
    %c0_1 = arith.constant 0 : index
    %c0_2 = arith.constant 0 : index
    %1 = vector.load %arg2[%c0_1, %c0_2] : memref<128x128xbf16, #tpu.memory_space<vmem>>, vector<128x128xbf16>
    %cst = arith.constant dense<0.000000e+00> : vector<16x128xf32>
    %2 = tpu.matmul %0, %1, %cst {dimension_numbers = #tpu.dot_dimension_numbers<[1], [0], [0], [1], [0, 0, 1, 1], [], []>} : vector<16x128xbf16>, vector<128x128xbf16>, vector<16x128xf32> -> vector<16x128xf32>
    %c0_3 = arith.constant 0 : index
    %c0_4 = arith.constant 0 : index
    %3 = vector.load %arg3[%c0_3, %c0_4] : memref<1x128xf32, #tpu.memory_space<vmem>>, vector<1x128xf32>
    %4 = vector.broadcast %3 : vector<1x128xf32> to vector<16x128xf32>
    %5 = arith.addf %2, %4 : vector<16x128xf32>
    %cst_5 = arith.constant 5.000000e-01 : f32
    %6 = vector.broadcast %cst_5 : f32 to vector<16x128xf32>
    %7 = arith.mulf %6, %5 : vector<16x128xf32>
    %cst_6 = arith.constant 0.707106769 : f32
    %8 = vector.broadcast %cst_6 : f32 to vector<16x128xf32>
    %9 = arith.mulf %5, %8 : vector<16x128xf32>
    %10 = math.erf %9 : vector<16x128xf32>
    %cst_7 = arith.constant 1.000000e+00 : f32
    %11 = vector.broadcast %cst_7 : f32 to vector<16x128xf32>
    %12 = arith.addf %11, %10 : vector<16x128xf32>
    %13 = arith.mulf %7, %12 : vector<16x128xf32>
    %14 = arith.truncf %13 : vector<16x128xf32> to vector<16x128xbf16>
    %c0_8 = arith.constant 0 : index
    %c0_9 = arith.constant 0 : index
    %15 = vector.load %arg4[%c0_8, %c0_9] : memref<128x128xbf16, #tpu.memory_space<vmem>>, vector<128x128xbf16>
    %cst_10 = arith.constant dense<0.000000e+00> : vector<16x128xf32>
    %16 = tpu.matmul %14, %15, %cst_10 {dimension_numbers = #tpu.dot_dimension_numbers<[1], [0], [0], [1], [0, 0, 1, 1], [], []>} : vector<16x128xbf16>, vector<128x128xbf16>, vector<16x128xf32> -> vector<16x128xf32>
    %c0_11 = arith.constant 0 : index
    %c0_12 = arith.constant 0 : index
    %17 = vector.load %arg5[%c0_11, %c0_12] : memref<1x128xf32, #tpu.memory_space<vmem>>, vector<1x128xf32>
    %18 = vector.broadcast %17 : vector<1x128xf32> to vector<16x128xf32>
    %19 = arith.addf %16, %18 : vector<16x128xf32>
    %cst_13 = arith.constant 5.000000e-01 : f32
    %20 = vector.broadcast %cst_13 : f32 to vector<16x128xf32>
    %21 = arith.mulf %20, %19 : vector<16x128xf32>
    %cst_14 = arith.constant 0.707106769 : f32
    %22 = vector.broadcast %cst_14 : f32 to vector<16x128xf32>
    %23 = arith.mulf %19, %22 : vector<16x128xf32>
    %24 = math.erf %23 : vector<16x128xf32>
    %cst_15 = arith.constant 1.000000e+00 : f32
    %25 = vector.broadcast %cst_15 : f32 to vector<16x128xf32>
    %26 = arith.addf %25, %24 : vector<16x128xf32>
    %27 = arith.mulf %21, %26 : vector<16x128xf32>
    %28 = arith.truncf %27 : vector<16x128xf32> to vector<16x128xbf16>
    %c0_16 = arith.constant 0 : index
    %c0_17 = arith.constant 0 : index
    %29 = vector.load %arg6[%c0_16, %c0_17] : memref<128x128xbf16, #tpu.memory_space<vmem>>, vector<128x128xbf16>
    %cst_18 = arith.constant dense<0.000000e+00> : vector<16x128xf32>
    %30 = tpu.matmul %28, %29, %cst_18 {dimension_numbers = #tpu.dot_dimension_numbers<[1], [0], [0], [1], [0, 0, 1, 1], [], []>} : vector<16x128xbf16>, vector<128x128xbf16>, vector<16x128xf32> -> vector<16x128xf32>
    %c0_19 = arith.constant 0 : index
    %c0_20 = arith.constant 0 : index
    %31 = vector.load %arg7[%c0_19, %c0_20] : memref<1x128xf32, #tpu.memory_space<vmem>>, vector<1x128xf32>
    %32 = vector.broadcast %31 : vector<1x128xf32> to vector<16x128xf32>
    %33 = arith.addf %30, %32 : vector<16x128xf32>
    %cst_21 = arith.constant 5.000000e-01 : f32
    %34 = vector.broadcast %cst_21 : f32 to vector<16x128xf32>
    %35 = arith.mulf %34, %33 : vector<16x128xf32>
    %cst_22 = arith.constant 0.707106769 : f32
    %36 = vector.broadcast %cst_22 : f32 to vector<16x128xf32>
    %37 = arith.mulf %33, %36 : vector<16x128xf32>
    %38 = math.erf %37 : vector<16x128xf32>
    %cst_23 = arith.constant 1.000000e+00 : f32
    %39 = vector.broadcast %cst_23 : f32 to vector<16x128xf32>
    %40 = arith.addf %39, %38 : vector<16x128xf32>
    %41 = arith.mulf %35, %40 : vector<16x128xf32>
    %42 = arith.truncf %41 : vector<16x128xf32> to vector<16x128xbf16>
    %c0_24 = arith.constant 0 : index
    %c0_25 = arith.constant 0 : index
    %43 = vector.load %arg8[%c0_24, %c0_25] : memref<128x128xbf16, #tpu.memory_space<vmem>>, vector<128x128xbf16>
    %cst_26 = arith.constant dense<0.000000e+00> : vector<16x128xf32>
    %44 = tpu.matmul %42, %43, %cst_26 {dimension_numbers = #tpu.dot_dimension_numbers<[1], [0], [0], [1], [0, 0, 1, 1], [], []>} : vector<16x128xbf16>, vector<128x128xbf16>, vector<16x128xf32> -> vector<16x128xf32>
    %c0_27 = arith.constant 0 : index
    %c0_28 = arith.constant 0 : index
    %45 = vector.load %arg9[%c0_27, %c0_28] : memref<1x128xf32, #tpu.memory_space<vmem>>, vector<1x128xf32>
    %46 = vector.broadcast %45 : vector<1x128xf32> to vector<16x128xf32>
    %47 = arith.addf %44, %46 : vector<16x128xf32>
    %cst_29 = arith.constant 5.000000e-01 : f32
    %48 = vector.broadcast %cst_29 : f32 to vector<16x128xf32>
    %49 = arith.mulf %48, %47 : vector<16x128xf32>
    %cst_30 = arith.constant 0.707106769 : f32
    %50 = vector.broadcast %cst_30 : f32 to vector<16x128xf32>
    %51 = arith.mulf %47, %50 : vector<16x128xf32>
    %52 = math.erf %51 : vector<16x128xf32>
    %cst_31 = arith.constant 1.000000e+00 : f32
    %53 = vector.broadcast %cst_31 : f32 to vector<16x128xf32>
    %54 = arith.addf %53, %52 : vector<16x128xf32>
    %55 = arith.mulf %49, %54 : vector<16x128xf32>
    %56 = arith.truncf %55 : vector<16x128xf32> to vector<16x128xbf16>
    %c0_32 = arith.constant 0 : index
    %c0_33 = arith.constant 0 : index
    %57 = vector.load %arg10[%c0_32, %c0_33] : memref<128x128xbf16, #tpu.memory_space<vmem>>, vector<128x128xbf16>
    %cst_34 = arith.constant dense<0.000000e+00> : vector<16x128xf32>
    %58 = tpu.matmul %56, %57, %cst_34 {dimension_numbers = #tpu.dot_dimension_numbers<[1], [0], [0], [1], [0, 0, 1, 1], [], []>} : vector<16x128xbf16>, vector<128x128xbf16>, vector<16x128xf32> -> vector<16x128xf32>
    %c0_35 = arith.constant 0 : index
    %c0_36 = arith.constant 0 : index
    %59 = vector.load %arg11[%c0_35, %c0_36] : memref<1x128xf32, #tpu.memory_space<vmem>>, vector<1x128xf32>
    %60 = vector.broadcast %59 : vector<1x128xf32> to vector<16x128xf32>
    %61 = arith.addf %58, %60 : vector<16x128xf32>
    %c0_37 = arith.constant 0 : index
    %c0_38 = arith.constant 0 : index
    %62 = vector.load %arg12[%c0_37, %c0_38] : memref<16x128xf32, #tpu.memory_space<vmem>>, vector<16x128xf32>
    tpu.vector_store %arg12[%c0_37, %c0_38], %61 {strides = array<i32>} : memref<16x128xf32, #tpu.memory_space<vmem>>, vector<16x128xf32>,
    return
  }
  func.func @transform_0(%arg0: i32) -> (i32, i32) {
    %c0_i32 = arith.constant 0 : i32
    %c0_i32_0 = arith.constant 0 : i32
    return %arg0, %c0_i32 : i32, i32
  }
  func.func @transform_1(%arg0: i32) -> (i32, i32) {
    %c0_i32 = arith.constant 0 : i32
    %c0_i32_0 = arith.constant 0 : i32
    %c0_i32_1 = arith.constant 0 : i32
    return %c0_i32, %c0_i32_0 : i32, i32
  }
  func.func @transform_2(%arg0: i32) -> (i32, i32) {
    %c0_i32 = arith.constant 0 : i32
    %c0_i32_0 = arith.constant 0 : i32
    %c0_i32_1 = arith.constant 0 : i32
    return %c0_i32, %c0_i32_0 : i32, i32
  }
  func.func @transform_3(%arg0: i32) -> (i32, i32) {
    %c0_i32 = arith.constant 0 : i32
    %c0_i32_0 = arith.constant 0 : i32
    %c0_i32_1 = arith.constant 0 : i32
    return %c0_i32, %c0_i32_0 : i32, i32
  }
  func.func @transform_4(%arg0: i32) -> (i32, i32) {
    %c0_i32 = arith.constant 0 : i32
    %c0_i32_0 = arith.constant 0 : i32
    %c0_i32_1 = arith.constant 0 : i32
    return %c0_i32, %c0_i32_0 : i32, i32
  }
  func.func @transform_5(%arg0: i32) -> (i32, i32) {
    %c0_i32 = arith.constant 0 : i32
    %c0_i32_0 = arith.constant 0 : i32
    %c0_i32_1 = arith.constant 0 : i32
    return %c0_i32, %c0_i32_0 : i32, i32
  }
  func.func @transform_6(%arg0: i32) -> (i32, i32) {
    %c0_i32 = arith.constant 0 : i32
    %c0_i32_0 = arith.constant 0 : i32
    %c0_i32_1 = arith.constant 0 : i32
    return %c0_i32, %c0_i32_0 : i32, i32
  }
  func.func @transform_7(%arg0: i32) -> (i32, i32) {
    %c0_i32 = arith.constant 0 : i32
    %c0_i32_0 = arith.constant 0 : i32
    %c0_i32_1 = arith.constant 0 : i32
    return %c0_i32, %c0_i32_0 : i32, i32
  }
  func.func @transform_8(%arg0: i32) -> (i32, i32) {
    %c0_i32 = arith.constant 0 : i32
    %c0_i32_0 = arith.constant 0 : i32
    %c0_i32_1 = arith.constant 0 : i32
    return %c0_i32, %c0_i32_0 : i32, i32
  }
  func.func @transform_9(%arg0: i32) -> (i32, i32) {
    %c0_i32 = arith.constant 0 : i32
    %c0_i32_0 = arith.constant 0 : i32
    %c0_i32_1 = arith.constant 0 : i32
    return %c0_i32, %c0_i32_0 : i32, i32
  }
  func.func @transform_10(%arg0: i32) -> (i32, i32) {
    %c0_i32 = arith.constant 0 : i32
    %c0_i32_0 = arith.constant 0 : i32
    %c0_i32_1 = arith.constant 0 : i32
    return %c0_i32, %c0_i32_0 : i32, i32
  }
  func.func @transform_11(%arg0: i32) -> (i32, i32) {
    %c0_i32 = arith.constant 0 : i32
    %c0_i32_0 = arith.constant 0 : i32
    return %arg0, %c0_i32 : i32, i32
  }
}

module attributes {stable_mosaic.version = 11 : i64} {
  func.func @_mlp_fused_kernel(%arg0: i32, %arg1: memref<16x128xbf16, #tpu.memory_space<vmem>>, %arg2: memref<128x128xbf16, #tpu.memory_space<vmem>>, %arg3: memref<1x128xf32, #tpu.memory_space<vmem>>, %arg4: memref<128x128xbf16, #tpu.memory_space<vmem>>, %arg5: memref<1x128xf32, #tpu.memory_space<vmem>>, %arg6: memref<128x128xbf16, #tpu.memory_space<vmem>>, %arg7: memref<1x128xf32, #tpu.memory_space<vmem>>, %arg8: memref<128x128xbf16, #tpu.memory_space<vmem>>, %arg9: memref<1x128xf32, #tpu.memory_space<vmem>>, %arg10: memref<128x128xbf16, #tpu.memory_space<vmem>>, %arg11: memref<1x128xf32, #tpu.memory_space<vmem>>, %arg12: memref<16x128xf32, #tpu.memory_space<vmem>>) attributes {dimension_semantics = [#tpu.dimension_semantics<parallel>], iteration_bounds = array<i64: 1>, scalar_prefetch = 0 : i64, scratch_operands = 0 : i64, tpu.core_type = #tpu.core_type<tc>, window_params = [{transform_indices = @transform_0, window_bounds = array<i64: 16, 128>}, {pipeline_mode = #tpu.pipeline_mode<synchronous>, transform_indices = @transform_1, window_bounds = array<i64: 128, 128>}, {pipeline_mode = #tpu.pipeline_mode<synchronous>, transform_indices = @transform_2, window_bounds = array<i64: 1, 128>}, {pipeline_mode = #tpu.pipeline_mode<synchronous>, transform_indices = @transform_3, window_bounds = array<i64: 128, 128>}, {pipeline_mode = #tpu.pipeline_mode<synchronous>, transform_indices = @transform_4, window_bounds = array<i64: 1, 128>}, {pipeline_mode = #tpu.pipeline_mode<synchronous>, transform_indices = @transform_5, window_bounds = array<i64: 128, 128>}, {pipeline_mode = #tpu.pipeline_mode<synchronous>, transform_indices = @transform_6, window_bounds = array<i64: 1, 128>}, {pipeline_mode = #tpu.pipeline_mode<synchronous>, transform_indices = @transform_7, window_bounds = array<i64: 128, 128>}, {pipeline_mode = #tpu.pipeline_mode<synchronous>, transform_indices = @transform_8, window_bounds = array<i64: 1, 128>}, {pipeline_mode = #tpu.pipeline_mode<synchronous>, transform_indices = @transform_9, window_bounds = array<i64: 128, 128>}, {pipeline_mode = #tpu.pipeline_mode<synchronous>, transform_indices = @transform_10, window_bounds = array<i64: 1, 128>}, {transform_indices = @transform_11, window_bounds = array<i64: 16, 128>}]} {
    %c0 = arith.constant 0 : index
    %c0_0 = arith.constant 0 : index
    %0 = vector.load %arg1[%c0, %c0_0] : memref<16x128xbf16, #tpu.memory_space<vmem>>, vector<16x128xbf16>
    %c0_1 = arith.constant 0 : index
    %c0_2 = arith.constant 0 : index
    %1 = vector.load %arg2[%c0_1, %c0_2] : memref<128x128xbf16, #tpu.memory_space<vmem>>, vector<128x128xbf16>
    %cst = arith.constant dense<0.000000e+00> : vector<16x128xf32>
    %2 = tpu.matmul %0, %1, %cst {dimension_numbers = #tpu.dot_dimension_numbers<[1], [0], [0], [1], [0, 0, 1, 1], [], []>} : vector<16x128xbf16>, vector<128x128xbf16>, vector<16x128xf32> -> vector<16x128xf32>
    %c0_3 = arith.constant 0 : index
    %c0_4 = arith.constant 0 : index
    %3 = vector.load %arg3[%c0_3, %c0_4] : memref<1x128xf32, #tpu.memory_space<vmem>>, vector<1x128xf32>
    %4 = vector.broadcast %3 : vector<1x128xf32> to vector<16x128xf32>
    %5 = arith.addf %2, %4 : vector<16x128xf32>
    %cst_5 = arith.constant 5.000000e-01 : f32
    %6 = vector.broadcast %cst_5 : f32 to vector<16x128xf32>
    %7 = arith.mulf %6, %5 : vector<16x128xf32>
    %cst_6 = arith.constant 0.707106769 : f32
    %8 = vector.broadcast %cst_6 : f32 to vector<16x128xf32>
    %9 = arith.mulf %5, %8 : vector<16x128xf32>
    %10 = math.erf %9 : vector<16x128xf32>
    %cst_7 = arith.constant 1.000000e+00 : f32
    %11 = vector.broadcast %cst_7 : f32 to vector<16x128xf32>
    %12 = arith.addf %11, %10 : vector<16x128xf32>
    %13 = arith.mulf %7, %12 : vector<16x128xf32>
    %14 = arith.truncf %13 : vector<16x128xf32> to vector<16x128xbf16>
    %c0_8 = arith.constant 0 : index
    %c0_9 = arith.constant 0 : index
    %15 = vector.load %arg4[%c0_8, %c0_9] : memref<128x128xbf16, #tpu.memory_space<vmem>>, vector<128x128xbf16>
    %cst_10 = arith.constant dense<0.000000e+00> : vector<16x128xf32>
    %16 = tpu.matmul %14, %15, %cst_10 {dimension_numbers = #tpu.dot_dimension_numbers<[1], [0], [0], [1], [0, 0, 1, 1], [], []>} : vector<16x128xbf16>, vector<128x128xbf16>, vector<16x128xf32> -> vector<16x128xf32>
    %c0_11 = arith.constant 0 : index
    %c0_12 = arith.constant 0 : index
    %17 = vector.load %arg5[%c0_11, %c0_12] : memref<1x128xf32, #tpu.memory_space<vmem>>, vector<1x128xf32>
    %18 = vector.broadcast %17 : vector<1x128xf32> to vector<16x128xf32>
    %19 = arith.addf %16, %18 : vector<16x128xf32>
    %cst_13 = arith.constant 5.000000e-01 : f32
    %20 = vector.broadcast %cst_13 : f32 to vector<16x128xf32>
    %21 = arith.mulf %20, %19 : vector<16x128xf32>
    %cst_14 = arith.constant 0.707106769 : f32
    %22 = vector.broadcast %cst_14 : f32 to vector<16x128xf32>
    %23 = arith.mulf %19, %22 : vector<16x128xf32>
    %24 = math.erf %23 : vector<16x128xf32>
    %cst_15 = arith.constant 1.000000e+00 : f32
    %25 = vector.broadcast %cst_15 : f32 to vector<16x128xf32>
    %26 = arith.addf %25, %24 : vector<16x128xf32>
    %27 = arith.mulf %21, %26 : vector<16x128xf32>
    %28 = arith.truncf %27 : vector<16x128xf32> to vector<16x128xbf16>
    %c0_16 = arith.constant 0 : index
    %c0_17 = arith.constant 0 : index
    %29 = vector.load %arg6[%c0_16, %c0_17] : memref<128x128xbf16, #tpu.memory_space<vmem>>, vector<128x128xbf16>
    %cst_18 = arith.constant dense<0.000000e+00> : vector<16x128xf32>
    %30 = tpu.matmul %28, %29, %cst_18 {dimension_numbers = #tpu.dot_dimension_numbers<[1], [0], [0], [1], [0, 0, 1, 1], [], []>} : vector<16x128xbf16>, vector<128x128xbf16>, vector<16x128xf32> -> vector<16x128xf32>
    %c0_19 = arith.constant 0 : index
    %c0_20 = arith.constant 0 : index
    %31 = vector.load %arg7[%c0_19, %c0_20] : memref<1x128xf32, #tpu.memory_space<vmem>>, vector<1x128xf32>
    %32 = vector.broadcast %31 : vector<1x128xf32> to vector<16x128xf32>
    %33 = arith.addf %30, %32 : vector<16x128xf32>
    %cst_21 = arith.constant 5.000000e-01 : f32
    %34 = vector.broadcast %cst_21 : f32 to vector<16x128xf32>
    %35 = arith.mulf %34, %33 : vector<16x128xf32>
    %cst_22 = arith.constant 0.707106769 : f32
    %36 = vector.broadcast %cst_22 : f32 to vector<16x128xf32>
    %37 = arith.mulf %33, %36 : vector<16x128xf32>
    %38 = math.erf %37 : vector<16x128xf32>
    %cst_23 = arith.constant 1.000000e+00 : f32
    %39 = vector.broadcast %cst_23 : f32 to vector<16x128xf32>
    %40 = arith.addf %39, %38 : vector<16x128xf32>
    %41 = arith.mulf %35, %40 : vector<16x128xf32>
    %42 = arith.truncf %41 : vector<16x128xf32> to vector<16x128xbf16>
    %c0_24 = arith.constant 0 : index
    %c0_25 = arith.constant 0 : index
    %43 = vector.load %arg8[%c0_24, %c0_25] : memref<128x128xbf16, #tpu.memory_space<vmem>>, vector<128x128xbf16>
    %cst_26 = arith.constant dense<0.000000e+00> : vector<16x128xf32>
    %44 = tpu.matmul %42, %43, %cst_26 {dimension_numbers = #tpu.dot_dimension_numbers<[1], [0], [0], [1], [0, 0, 1, 1], [], []>} : vector<16x128xbf16>, vector<128x128xbf16>, vector<16x128xf32> -> vector<16x128xf32>
    %c0_27 = arith.constant 0 : index
    %c0_28 = arith.constant 0 : index
    %45 = vector.load %arg9[%c0_27, %c0_28] : memref<1x128xf32, #tpu.memory_space<vmem>>, vector<1x128xf32>
    %46 = vector.broadcast %45 : vector<1x128xf32> to vector<16x128xf32>
    %47 = arith.addf %44, %46 : vector<16x128xf32>
    %cst_29 = arith.constant 5.000000e-01 : f32
    %48 = vector.broadcast %cst_29 : f32 to vector<16x128xf32>
    %49 = arith.mulf %48, %47 : vector<16x128xf32>
    %cst_30 = arith.constant 0.707106769 : f32
    %50 = vector.broadcast %cst_30 : f32 to vector<16x128xf32>
    %51 = arith.mulf %47, %50 : vector<16x128xf32>
    %52 = math.erf %51 : vector<16x128xf32>
    %cst_31 = arith.constant 1.000000e+00 : f32
    %53 = vector.broadcast %cst_31 : f32 to vector<16x128xf32>
    %54 = arith.addf %53, %52 : vector<16x128xf32>
    %55 = arith.mulf %49, %54 : vector<16x128xf32>
    %56 = arith.truncf %55 : vector<16x128xf32> to vector<16x128xbf16>
    %c0_32 = arith.constant 0 : index
    %c0_33 = arith.constant 0 : index
    %57 = vector.load %arg10[%c0_32, %c0_33] : memref<128x128xbf16, #tpu.memory_space<vmem>>, vector<128x128xbf16>
    %cst_34 = arith.constant dense<0.000000e+00> : vector<16x128xf32>
    %58 = tpu.matmul %56, %57, %cst_34 {dimension_numbers = #tpu.dot_dimension_numbers<[1], [0], [0], [1], [0, 0, 1, 1], [], []>} : vector<16x128xbf16>, vector<128x128xbf16>, vector<16x128xf32> -> vector<16x128xf32>
    %c0_35 = arith.constant 0 : index
    %c0_36 = arith.constant 0 : index
    %59 = vector.load %arg11[%c0_35, %c0_36] : memref<1x128xf32, #tpu.memory_space<vmem>>, vector<1x128xf32>
    %60 = vector.broadcast %59 : vector<1x128xf32> to vector<16x128xf32>
    %61 = arith.addf %58, %60 : vector<16x128xf32>
    %c0_37 = arith.constant 0 : index
    %c0_38 = arith.constant 0 : index
    %62 = vector.load %arg12[%c0_37, %c0_38] : memref<16x128xf32, #tpu.memory_space<vmem>>, vector<16x128xf32>
    tpu.vector_store %arg12[%c0_37, %c0_38], %61 {strides = array<i32>} : memref<16x128xf32, #tpu.memory_space<vmem>>, vector<16x128xf32>,
    return
  }
  func.func @transform_0(%arg0: i32) -> (i32, i32) {
    %c0_i32 = arith.constant 0 : i32
    %c0_i32_0 = arith.constant 0 : i32
    return %arg0, %c0_i32 : i32, i32
  }
  func.func @transform_1(%arg0: i32) -> (i32, i32) {
    %c0_i32 = arith.constant 0 : i32
    %c0_i32_0 = arith.constant 0 : i32
    %c0_i32_1 = arith.constant 0 : i32
    return %c0_i32, %c0_i32_0 : i32, i32
  }
  func.func @transform_2(%arg0: i32) -> (i32, i32) {
    %c0_i32 = arith.constant 0 : i32
    %c0_i32_0 = arith.constant 0 : i32
    %c0_i32_1 = arith.constant 0 : i32
    return %c0_i32, %c0_i32_0 : i32, i32
  }
  func.func @transform_3(%arg0: i32) -> (i32, i32) {
    %c0_i32 = arith.constant 0 : i32
    %c0_i32_0 = arith.constant 0 : i32
    %c0_i32_1 = arith.constant 0 : i32
    return %c0_i32, %c0_i32_0 : i32, i32
  }
  func.func @transform_4(%arg0: i32) -> (i32, i32) {
    %c0_i32 = arith.constant 0 : i32
    %c0_i32_0 = arith.constant 0 : i32
    %c0_i32_1 = arith.constant 0 : i32
    return %c0_i32, %c0_i32_0 : i32, i32
  }
  func.func @transform_5(%arg0: i32) -> (i32, i32) {
    %c0_i32 = arith.constant 0 : i32
    %c0_i32_0 = arith.constant 0 : i32
    %c0_i32_1 = arith.constant 0 : i32
    return %c0_i32, %c0_i32_0 : i32, i32
  }
  func.func @transform_6(%arg0: i32) -> (i32, i32) {
    %c0_i32 = arith.constant 0 : i32
    %c0_i32_0 = arith.constant 0 : i32
    %c0_i32_1 = arith.constant 0 : i32
    return %c0_i32, %c0_i32_0 : i32, i32
  }
  func.func @transform_7(%arg0: i32) -> (i32, i32) {
    %c0_i32 = arith.constant 0 : i32
    %c0_i32_0 = arith.constant 0 : i32
    %c0_i32_1 = arith.constant 0 : i32
    return %c0_i32, %c0_i32_0 : i32, i32
  }
  func.func @transform_8(%arg0: i32) -> (i32, i32) {
    %c0_i32 = arith.constant 0 : i32
    %c0_i32_0 = arith.constant 0 : i32
    %c0_i32_1 = arith.constant 0 : i32
    return %c0_i32, %c0_i32_0 : i32, i32
  }
  func.func @transform_9(%arg0: i32) -> (i32, i32) {
    %c0_i32 = arith.constant 0 : i32
    %c0_i32_0 = arith.constant 0 : i32
    %c0_i32_1 = arith.constant 0 : i32
    return %c0_i32, %c0_i32_0 : i32, i32
  }
  func.func @transform_10(%arg0: i32) -> (i32, i32) {
    %c0_i32 = arith.constant 0 : i32
    %c0_i32_0 = arith.constant 0 : i32
    %c0_i32_1 = arith.constant 0 : i32
    return %c0_i32, %c0_i32_0 : i32, i32
  }
  func.func @transform_11(%arg0: i32) -> (i32, i32) {
    %c0_i32 = arith.constant 0 : i32
    %c0_i32_0 = arith.constant 0 : i32
    return %arg0, %c0_i32 : i32, i32
  }
}

</mosaic_0001>

<bundles_post_ra>
// kernel: tpu_custom_call.1
= control target key start
LH: loop header
LB: loop body
LE: loop exit
PB: predicated region body
PF: predicated region fallthrough
CT: control target
= control target key end

     0   :  { %16 = vsyncpa [#allocation3], 0  ;;  %s1442_s0 = inlined_call_operand.hbm [shape: bf16[16,128], index: 0, kind: input, shape index: {}]   ;;  %s1443_s1 = inlined_call_operand.hbm [shape: bf16[128,128], index: 1, kind: input, shape index: {}]   ;;  %s1444_s2 = inlined_call_operand.vmem [shape: f32[1,128], index: 2, kind: input, shape index: {}]   ;;  %s1445_s3 = inlined_call_operand.hbm [shape: bf16[128,128], index: 3, kind: input, shape index: {}]   ;;  %s1446_s4 = inlined_call_operand.vmem [shape: f32[1,128], index: 4, kind: input, shape index: {}]   ;;  %s1447_s5 = inlined_call_operand.hbm [shape: bf16[128,128], index: 5, kind: input, shape index: {}]   ;;  %s1448_s6 = inlined_call_operand.vmem [shape: f32[1,128], index: 6, kind: input, shape index: {}]   ;;  %s1449_s7 = inlined_call_operand.hbm [shape: bf16[128,128], index: 7, kind: input, shape index: {}]   ;;  %s1450_s8 = inlined_call_operand.vmem [shape: f32[1,128], index: 8, kind: input, shape index: {}]   ;;  %s1451_s9 = inlined_call_operand.hbm [shape: bf16[128,128], index: 9, kind: input, shape index: {}]   ;;  %s1452_s10 = inlined_call_operand.vmem [shape: f32[1,128], index: 10, kind: input, shape index: {}]   ;;  %s1453_s11 = inlined_call_operand.hbm [shape: f32[16,128], index: 11, kind: output, shape index: {}]  }
   0x1   :  { %17 = vsyncpa [#allocation6], 0 }
   0x2   :  { %18 = vsyncpa [#allocation9], 0 }
   0x3   :  { %19 = vsyncpa [#allocation12], 0 }
   0x4   :  { %20 = vsyncpa [#allocation4], 0  ;;  %s1181_s17 = smov [#allocation5]   ;;  %s1182_s19 = smov [#allocation8]  }
   0x5   :  { %s38_s18 = sshll.u32 %s1181_s17, 4  ;;  %s66_s20 = sshll.u32 %s1182_s19, 4  ;;  %s39_s18 = int_to_ptr.vmem [resolvable:$true] %s38_s18  ;;  %s1254_s20 = int_to_ptr.vmem [resolvable:$true] %s66_s20 }
   0x6   :  { %s1017_s23 = scalar_lea.hbm %s1443_s1, 1024 }
   0x7   :  { %p1018_p0 = scmp.ne.s32.totalorder %s1443_s1, %s1017_s23  ;;  %p1021_p1 = scmp.lt.u32.totalorder %s1017_s23, %s1443_s1 }
   0x9   :  { %p1023_p2 = pnand %p1021_p1, %p1018_p0 }
   0xb   :  { %1026 = shalt.err (!%p1023_p2)
}
   0xc   :  { %s1027_s28 = scalar_lea.vmem %s39_s18, 1024  ;;  %p1032_p4 = scmp.lt.s32.totalorder %s39_s18, %s39_s18 }
   0xd   :  { %p1028_p3 = scmp.ne.s32.totalorder %s39_s18, %s1027_s28  ;;  %p1033_p5 = scmp.lt.s32.totalorder %s1027_s28, %s1027_s28 }
   0xf   :  { %p1034_p6 = por %p1033_p5, %p1032_p4 }
  0x11   :  { %p1035_p7 = pnand %p1034_p6, %p1028_p3 }
  0x13   :  { %1038 = shalt.err (!%p1035_p7)
}
  0x14   :  { %s1183_s29 = smov 64   ;;  %s1184_s30 = smov 4  }
  0x15   :  { %44 = dma.hbm_to_vmem [thread:$0]  %s1443_s1, 1024, %s39_s18, [#allocation6], %s1183_s29, %s1183_s29, %s1184_s30  }
  0x16   :  { %s1039_s16 = scalar_lea.hbm %s1447_s5, 1024 }
  0x17   :  { %p1040_p8 = scmp.ne.s32.totalorder %s1447_s5, %s1039_s16  ;;  %p1043_p9 = scmp.lt.u32.totalorder %s1039_s16, %s1447_s5 }
  0x19   :  { %p1045_p10 = pnand %p1043_p9, %p1040_p8 }
  0x1b   :  { %1048 = shalt.err (!%p1045_p10)
}
  0x1c   :  { %s1049_s23 = scalar_lea.vmem %s1254_s20, 1024  ;;  %p1054_p12 = scmp.lt.s32.totalorder %s1254_s20, %s1254_s20 }
  0x1d   :  { %p1050_p11 = scmp.ne.s32.totalorder %s1254_s20, %s1049_s23  ;;  %p1055_p13 = scmp.lt.s32.totalorder %s1049_s23, %s1049_s23 }
  0x1f   :  { %p1056_p0 = por %p1055_p13, %p1054_p12 }
  0x21   :  { %p1057_p1 = pnand %p1056_p0, %p1050_p11 }
  0x23   :  { %1060 = shalt.err (!%p1057_p1)
}
  0x24   :  { %72 = dma.hbm_to_vmem [thread:$0]  %s1447_s5, 1024, %s1254_s20, [#allocation9], %s1183_s29, %s1183_s29, %s1184_s30  }
  0x25   :  { %s1185_s24 = smov [#allocation2]   ;;  %s1186_s26 = smov [#allocation7]  }
  0x26   :  { %s26_s25 = sshll.u32 %s1185_s24, 4  ;;  %s52_s27 = sshll.u32 %s1186_s26, 4  ;;  %s27_s25 = int_to_ptr.vmem [resolvable:$true] %s26_s25  ;;  %s1291_s27 = int_to_ptr.vmem [resolvable:$true] %s52_s27 }
  0x27   :  { %s1061_s13 = scalar_lea.hbm %s1442_s0, 128 }
  0x28   :  { %p1062_p2 = scmp.ne.s32.totalorder %s1442_s0, %s1061_s13  ;;  %p1065_p3 = scmp.lt.u32.totalorder %s1061_s13, %s1442_s0 }
  0x2a   :  { %p1067_p4 = pnand %p1065_p3, %p1062_p2 }
  0x2c   :  { %1070 = shalt.err (!%p1067_p4)
}
  0x2d   :  { %s1071_s5 = scalar_lea.vmem %s27_s25, 128  ;;  %p1076_p6 = scmp.lt.s32.totalorder %s27_s25, %s27_s25 }
  0x2e   :  { %p1072_p5 = scmp.ne.s32.totalorder %s27_s25, %s1071_s5  ;;  %p1077_p7 = scmp.lt.s32.totalorder %s1071_s5, %s1071_s5 }
  0x30   :  { %p1078_p8 = por %p1077_p7, %p1076_p6 }
  0x32   :  { %p1079_p9 = pnand %p1078_p8, %p1072_p5 }
  0x34   :  { %1082 = shalt.err (!%p1079_p9)
}
  0x35   :  { %32 = dma.hbm_to_vmem [thread:$0]  %s1442_s0, 128, %s27_s25, [#allocation3], %s1183_s29, %s1183_s29, %s1184_s30  }
  0x36   :  { %s1083_s23 = scalar_lea.hbm %s1445_s3, 1024 }
  0x37   :  { %p1084_p10 = scmp.ne.s32.totalorder %s1445_s3, %s1083_s23  ;;  %p1087_p11 = scmp.lt.u32.totalorder %s1083_s23, %s1445_s3 }
  0x39   :  { %p1089_p12 = pnand %p1087_p11, %p1084_p10 }
  0x3b   :  { %1092 = shalt.err (!%p1089_p12)
}
  0x3c   :  { %s1093_s28 = scalar_lea.vmem %s1291_s27, 1024  ;;  %p1098_p0 = scmp.lt.s32.totalorder %s1291_s27, %s1291_s27 }
  0x3d   :  { %p1094_p13 = scmp.ne.s32.totalorder %s1291_s27, %s1093_s28  ;;  %p1099_p1 = scmp.lt.s32.totalorder %s1093_s28, %s1093_s28 }
  0x3f   :  { %p1100_p2 = por %p1099_p1, %p1098_p0 }
  0x41   :  { %p1101_p3 = pnand %p1100_p2, %p1094_p13 }
  0x43   :  { %1104 = shalt.err (!%p1101_p3)
}
  0x44   :  { %58 = dma.hbm_to_vmem [thread:$0]  %s1445_s3, 1024, %s1291_s27, [#allocation6], %s1183_s29, %s1183_s29, %s1184_s30  }
  0x45   :  { %s1187_s12 = smov [#allocation10]   ;;  %s1188_s14 = smov [#allocation11]  }
  0x46   :  { %s80_s13 = sshll.u32 %s1187_s12, 4  ;;  %s94_s15 = sshll.u32 %s1188_s14, 4  ;;  %s81_s13 = int_to_ptr.vmem [resolvable:$true] %s80_s13  ;;  %s1328_s15 = int_to_ptr.vmem [resolvable:$true] %s94_s15 }
  0x47   :  { %s1105_s5 = scalar_lea.hbm %s1449_s7, 1024 }
  0x48   :  { %p1106_p4 = scmp.ne.s32.totalorder %s1449_s7, %s1105_s5  ;;  %p1109_p5 = scmp.lt.u32.totalorder %s1105_s5, %s1449_s7 }
  0x4a   :  { %p1111_p6 = pnand %p1109_p5, %p1106_p4 }
  0x4c   :  { %1114 = shalt.err (!%p1111_p6)
}
  0x4d   :  { %s1115_s3 = scalar_lea.vmem %s81_s13, 1024  ;;  %p1120_p8 = scmp.lt.s32.totalorder %s81_s13, %s81_s13 }
  0x4e   :  { %p1116_p7 = scmp.ne.s32.totalorder %s81_s13, %s1115_s3  ;;  %p1121_p9 = scmp.lt.s32.totalorder %s1115_s3, %s1115_s3 }
  0x50   :  { %p1122_p10 = por %p1121_p9, %p1120_p8 }
  0x52   :  { %p1123_p11 = pnand %p1122_p10, %p1116_p7 }
  0x54   :  { %1126 = shalt.err (!%p1123_p11)
}
  0x55   :  { %86 = dma.hbm_to_vmem [thread:$0]  %s1449_s7, 1024, %s81_s13, [#allocation9], %s1183_s29, %s1183_s29, %s1184_s30  }
  0x56   :  { %s1127_s24 = scalar_lea.hbm %s1451_s9, 1024 }
  0x57   :  { %p1128_p12 = scmp.ne.s32.totalorder %s1451_s9, %s1127_s24  ;;  %p1131_p13 = scmp.lt.u32.totalorder %s1127_s24, %s1451_s9 }
  0x59   :  { %p1133_p0 = pnand %p1131_p13, %p1128_p12 }
  0x5b   :  { %1136 = shalt.err (!%p1133_p0)
}
  0x5c   :  { %s1137_s12 = scalar_lea.vmem %s1328_s15, 1024  ;;  %p1142_p2 = scmp.lt.s32.totalorder %s1328_s15, %s1328_s15 }
  0x5d   :  { %p1138_p1 = scmp.ne.s32.totalorder %s1328_s15, %s1137_s12  ;;  %p1143_p3 = scmp.lt.s32.totalorder %s1137_s12, %s1137_s12 }
  0x5f   :  { %p1144_p4 = por %p1143_p3, %p1142_p2 }
  0x61   :  { %p1145_p5 = pnand %p1144_p4, %p1138_p1 }
  0x63   :  { %1148 = shalt.err (!%p1145_p5)
}
  0x64   :  { %100 = dma.hbm_to_vmem [thread:$0]  %s1451_s9, 1024, %s1328_s15, [#allocation12], %s1183_s29, %s1183_s29, %s1184_s30  }
  0x65   :  { %1171 = dma.done.wait [#allocation3], 128  }
  0x66   :  { %1172 = vsyncadd [#allocation3], 4294967168 }
  0x67   :  { %1173 = dma.done.wait [#allocation6], 2048  }
  0x68   :  { %1174 = vsyncadd [#allocation6], 4294965248 }
  0x69   :  { %1175 = dma.done.wait [#allocation9], 2048  }
  0x6a   :  { %1176 = vsyncadd [#allocation9], 4294965248 }
  0x6b   :  { %1177 = dma.done.wait [#allocation12], 1024  }
  0x6c   :  { %1178 = vsyncadd [#allocation12], 4294966272  ;;  %v1189_v0 = vmov 0.0   ;;  %vm1190_vm0 = vmmov 0   ;;  %v960_v1 = vld [vmem:[#allocation5] sm:$0xff]   ;;  %v961_v2 = vld [vmem:[#allocation5 + $0x8] sm:$0xff]  }
  0x6d   :  { %847 = vmatprep.subr.bf16.mxu0 %v1189_v0  ;;  %863 = vmatprep.mubr.msk.bf16.mxu0 %vm1190_vm0, %v1189_v0  ;;  %v962_v3 = vld [vmem:[#allocation5 + $0x10] sm:$0xff]   ;;  %v969_v4 = vld [vmem:[#allocation7] sm:$0xff]   ;;  %v963_v5 = vld [vmem:[#allocation5 + $0x18] sm:$0xff]   ;;  %s1191_s17 = smov [#allocation13]  }
  0x6e   :  { %867 = vmatprep.subr.bf16.mxu1 %v1189_v0  ;;  %883 = vmatprep.mubr.msk.bf16.mxu1 %vm1190_vm0, %v1189_v0  ;;  %v970_v6 = vld [vmem:[#allocation7 + $0x8] sm:$0xff]   ;;  %v964_v7 = vld [vmem:[#allocation5 + $0x20] sm:$0xff]   ;;  %v966_v9 = vld [vmem:[#allocation5 + $0x30] sm:$0xff]   ;;  %s741_s5 = sshll.u32 %s1191_s17, 4  ;;  %s742_s5 = int_to_ptr.vmem [resolvable:$true] %s741_s5 }
  0x6f   :  { %848 = vmatpush3.bf16.msra.mxu0 %v960_v1  ;;  %868 = vmatpush3.bf16.msra.mxu1 %v969_v4  ;;  %v965_v8 = vld [vmem:[#allocation5 + $0x28] sm:$0xff]   ;;  %v967_v10 = vld [vmem:[#allocation5 + $0x38] sm:$0xff]   ;;  %v971_v12 = vld [vmem:[#allocation7 + $0x10] sm:$0xff]   ;;  %s1149_s20 = scalar_lea.vmem %s742_s5, 256  ;;  %p1154_p7 = scmp.lt.s32.totalorder %s742_s5, %s742_s5 }
  0x70   :  { %849 = vmatprep.subr.bf16.mxu0 %v1189_v0  ;;  %869 = vmatprep.subr.bf16.mxu1 %v1189_v0  ;;  %v968_v11 = vld [vmem:[#allocation2] sm:$0xff]   ;;  %v973_v14 = vld [vmem:[#allocation7 + $0x20] sm:$0xff]   ;;  %v974_v15 = vld [vmem:[#allocation7 + $0x28] sm:$0xff]   ;;  %p1150_p6 = scmp.ne.s32.totalorder %s742_s5, %s1149_s20  ;;  %p1155_p8 = scmp.lt.s32.totalorder %s1149_s20, %s1149_s20 }
  0x71   :  { %v972_v13 = vld [vmem:[#allocation7 + $0x18] sm:$0xff]   ;;  %v975_v16 = vld [vmem:[#allocation7 + $0x30] sm:$0xff]   ;;  %v977_v18 = vld [vmem:[#allocation8] sm:$0xff]  }
  0x72   :  { %v976_v17 = vld [vmem:[#allocation7 + $0x38] sm:$0xff]   ;;  %v978_v19 = vld [vmem:[#allocation8 + $0x8] sm:$0xff]   ;;  %v979_v38 = vld [vmem:[#allocation8 + $0x10] sm:$0xff]   ;;  %p1156_p9 = por %p1155_p8, %p1154_p7 }
  0x73   :  { %850 = vmatpush3.bf16.msra.mxu0 %v961_v2  ;;  %870 = vmatpush3.bf16.msra.mxu1 %v970_v6  ;;  %v756_v20 = vld [vmem:[%s1444_s2] ss:$0 sm:$0xff]  ;;  %v981_v40 = vld [vmem:[#allocation8 + $0x20] sm:$0xff]   ;;  %v982_v41 = vld [vmem:[#allocation8 + $0x28] sm:$0xff]  }
  0x74   :  { %851 = vmatprep.subr.bf16.mxu0 %v1189_v0  ;;  %871 = vmatprep.subr.bf16.mxu1 %v1189_v0  ;;  %v980_v39 = vld [vmem:[#allocation8 + $0x18] sm:$0xff]   ;;  %v983_v42 = vld [vmem:[#allocation8 + $0x30] sm:$0xff]   ;;  %v985_v44 = vld [vmem:[#allocation10] sm:$0xff]   ;;  %p1157_p10 = pnand %p1156_p9, %p1150_p6 }
  0x75   :  { %v984_v43 = vld [vmem:[#allocation8 + $0x38] sm:$0xff]   ;;  %v986_v45 = vld [vmem:[#allocation10 + $0x8] sm:$0xff]   ;;  %v987_v1 = vld [vmem:[#allocation10 + $0x10] sm:$0xff]  }
  0x76   :  { %v766_v46 = vld [vmem:[%s1446_s4] ss:$0 sm:$0xff]  ;;  %v990_v4 = vld [vmem:[#allocation10 + $0x28] sm:$0xff]  }
  0x77   :  { %852 = vmatpush3.bf16.msra.mxu0 %v962_v3  ;;  %872 = vmatpush3.bf16.msra.mxu1 %v971_v12  ;;  %v988_v2 = vld [vmem:[#allocation10 + $0x18] sm:$0xff]   ;;  %v989_v3 = vld [vmem:[#allocation10 + $0x20] sm:$0xff]  }
  0x78   :  { %853 = vmatprep.subr.bf16.mxu0 %v1189_v0  ;;  %873 = vmatprep.subr.bf16.mxu1 %v1189_v0  ;;  %v992_v6 = vld [vmem:[#allocation10 + $0x38] sm:$0xff]  }
  0x7b   :  { %854 = vmatpush3.bf16.msra.mxu0 %v963_v5  ;;  %874 = vmatpush3.bf16.msra.mxu1 %v972_v13  ;;  %v991_v5 = vld [vmem:[#allocation10 + $0x30] sm:$0xff]  }
  0x7c   :  { %855 = vmatprep.subr.bf16.mxu0 %v1189_v0  ;;  %875 = vmatprep.subr.bf16.mxu1 %v1189_v0 }
  0x7f   :  { %856 = vmatpush3.bf16.msra.mxu0 %v964_v7  ;;  %876 = vmatpush3.bf16.msra.mxu1 %v973_v14  ;;  %v993_v7 = vld [vmem:[#allocation11] sm:$0xff]  }
  0x80   :  { %857 = vmatprep.subr.bf16.mxu0 %v1189_v0  ;;  %877 = vmatprep.subr.bf16.mxu1 %v1189_v0 }
  0x83   :  { %858 = vmatpush3.bf16.msra.mxu0 %v965_v8  ;;  %878 = vmatpush3.bf16.msra.mxu1 %v974_v15  ;;  %v994_v8 = vld [vmem:[#allocation11 + $0x8] sm:$0xff]  }
  0x84   :  { %859 = vmatprep.subr.bf16.mxu0 %v1189_v0  ;;  %879 = vmatprep.subr.bf16.mxu1 %v1189_v0 }
  0x87   :  { %860 = vmatpush3.bf16.msra.mxu0 %v966_v9  ;;  %880 = vmatpush3.bf16.msra.mxu1 %v975_v16  ;;  %v775_v9 = vld [vmem:[%s1448_s6] ss:$0 sm:$0xff] }
  0x88   :  { %861 = vmatprep.subr.bf16.mxu0 %v1189_v0  ;;  %881 = vmatprep.subr.bf16.mxu1 %v1189_v0 }
  0x8b   :  { %862 = vmatpush3.bf16.msra.mxu0 %v967_v10  ;;  %882 = vmatpush3.bf16.msra.mxu1 %v976_v17 }
  0x8c   :  { %887 = vmatprep.subr.bf16.mxu0 %v1189_v0  ;;  %907 = vmatprep.subr.bf16.mxu1 %v1189_v0 }
  0x8e   :  { %864 = vmatmul.mubr.bf16.vlgmr.msra.gmra.mrb[0].mxu0 %v968_v11 }
  0x8f   :  { %903 = vmatprep.mubr.msk.bf16.mxu0 %vm1190_vm0, %v1189_v0  ;;  %888 = vmatpush3.bf16.msra.mxu0 %v977_v18 }
  0x90   :  { %889 = vmatprep.subr.bf16.mxu0 %v1189_v0 }
  0x93   :  { %890 = vmatpush3.bf16.msra.mxu0 %v978_v19 }
  0x94   :  { %891 = vmatprep.subr.bf16.mxu0 %v1189_v0 }
  0x97   :  { %892 = vmatpush3.bf16.msra.mxu0 %v979_v38 }
  0x98   :  { %893 = vmatprep.subr.bf16.mxu0 %v1189_v0 }
  0x9b   :  { %894 = vmatpush3.bf16.msra.mxu0 %v980_v39 }
  0x9c   :  { %895 = vmatprep.subr.bf16.mxu0 %v1189_v0 }
  0x9f   :  { %896 = vmatpush3.bf16.msra.mxu0 %v981_v40 }
  0xa0   :  { %897 = vmatprep.subr.bf16.mxu0 %v1189_v0 }
  0xa3   :  { %898 = vmatpush3.bf16.msra.mxu0 %v982_v41 }
  0xa4   :  { %899 = vmatprep.subr.bf16.mxu0 %v1189_v0 }
  0xa7   :  { %900 = vmatpush3.bf16.msra.mxu0 %v983_v42 }
  0xa8   :  { %901 = vmatprep.subr.bf16.mxu0 %v1189_v0 }
  0xab   :  { %902 = vmatpush3.bf16.msra.mxu0 %v984_v43 }
  0xac   :  { %927 = vmatprep.subr.bf16.mxu0 %v1189_v0 }
 0x161   :  { %v235_v21 = vpop.f32.mrb[0].mxu0 }
 0x162   :  { %v236_v22 = vadd.f32 %v756_v20, %v235_v21  ;;  %v865_v23 = vpop.f32.mrb[1].mxu0 }
 0x163   :  { %v238_v24 = vpop.f32.mrb[2].mxu0 }
 0x164   :  { %v244_v25 = vmul.f32 0.70710677, %v236_v22  ;;  %v239_v26 = vadd.f32 %v756_v20, %v238_v24  ;;  %v866_v27 = vpop.f32.mrb[3].mxu0  ;;  %v242_v32 = vmul.f32 0.5, %v236_v22 }
 0x165   :  { %v995_v27 = vld [vmem:[#allocation11 + $0x10] sm:$0xff]  }
 0x166   :  { %1001 = verf.f32 %v244_v25  ;;  %v245_v28 = vmul.f32 0.70710677, %v239_v26  ;;  %v243_v33 = vmul.f32 0.5, %v239_v26 }
 0x168   :  { %1003 = verf.f32 %v245_v28  ;;  %v996_v28 = vld [vmem:[#allocation11 + $0x18] sm:$0xff]  }
 0x170   :  { %v1002_v29 = vpop.eup %1001 }
 0x171   :  { %v248_v30 = vadd.f32 1.0, %v1002_v29  ;;  %v997_v29 = vld [vmem:[#allocation11 + $0x20] sm:$0xff]  }
 0x172   :  { %v1004_v31 = vpop.eup %1003 }
 0x173   :  { %v249_v34 = vadd.f32 1.0, %v1004_v31  ;;  %v250_v35 = vmul.f32 %v248_v30, %v242_v32  ;;  %v998_v30 = vld [vmem:[#allocation11 + $0x28] sm:$0xff]   ;;  %v999_v31 = vld [vmem:[#allocation11 + $0x30] sm:$0xff]   ;;  %v1000_v32 = vld [vmem:[#allocation11 + $0x38] sm:$0xff]  }
 0x175   :  { %v251_v36 = vmul.f32 %v249_v34, %v243_v33  ;;  %v784_v33 = vld [vmem:[%s1450_s8] ss:$0 sm:$0xff] }
 0x177   :  { %v252_v37 = vpack.c.bf16 %v251_v36, %v250_v35 }
 0x179   :  { %884 = vmatmul.mubr.bf16.vlgmr.msra.gmra.mrb[0].mxu1 %v252_v37 }
 0x17a   :  { %923 = vmatprep.mubr.msk.bf16.mxu1 %vm1190_vm0, %v1189_v0  ;;  %908 = vmatpush3.bf16.msra.mxu1 %v985_v44 }
 0x17b   :  { %909 = vmatprep.subr.bf16.mxu1 %v1189_v0 }
 0x17e   :  { %910 = vmatpush3.bf16.msra.mxu1 %v986_v45 }
 0x17f   :  { %911 = vmatprep.subr.bf16.mxu1 %v1189_v0 }
 0x182   :  { %912 = vmatpush3.bf16.msra.mxu1 %v987_v1 }
 0x183   :  { %913 = vmatprep.subr.bf16.mxu1 %v1189_v0 }
 0x186   :  { %914 = vmatpush3.bf16.msra.mxu1 %v988_v2 }
 0x187   :  { %915 = vmatprep.subr.bf16.mxu1 %v1189_v0 }
 0x18a   :  { %916 = vmatpush3.bf16.msra.mxu1 %v989_v3 }
 0x18b   :  { %917 = vmatprep.subr.bf16.mxu1 %v1189_v0 }
 0x18e   :  { %918 = vmatpush3.bf16.msra.mxu1 %v990_v4 }
 0x18f   :  { %919 = vmatprep.subr.bf16.mxu1 %v1189_v0 }
 0x192   :  { %920 = vmatpush3.bf16.msra.mxu1 %v991_v5 }
 0x193   :  { %921 = vmatprep.subr.bf16.mxu1 %v1189_v0 }
 0x196   :  { %922 = vmatpush3.bf16.msra.mxu1 %v992_v6 }
 0x24c   :  { %v358_v47 = vpop.f32.mrb[0].mxu1 }
 0x24d   :  { %v359_v48 = vadd.f32 %v766_v46, %v358_v47  ;;  %v885_v49 = vpop.f32.mrb[1].mxu1 }
 0x24e   :  { %v361_v50 = vpop.f32.mrb[2].mxu1 }
 0x24f   :  { %v367_v51 = vmul.f32 0.70710677, %v359_v48  ;;  %v362_v52 = vadd.f32 %v766_v46, %v361_v50  ;;  %v886_v53 = vpop.f32.mrb[3].mxu1  ;;  %v365_v58 = vmul.f32 0.5, %v359_v48  ;;  %v793_v50 = vld [vmem:[%s1452_s10] ss:$0 sm:$0xff] }
 0x251   :  { %1005 = verf.f32 %v367_v51  ;;  %v368_v54 = vmul.f32 0.70710677, %v362_v52  ;;  %v366_v59 = vmul.f32 0.5, %v362_v52 }
 0x253   :  { %1007 = verf.f32 %v368_v54 }
 0x25b   :  { %v1006_v55 = vpop.eup %1005 }
 0x25c   :  { %v371_v56 = vadd.f32 1.0, %v1006_v55 }
 0x25d   :  { %v1008_v57 = vpop.eup %1007 }
 0x25e   :  { %v372_v60 = vadd.f32 1.0, %v1008_v57  ;;  %v373_v61 = vmul.f32 %v371_v56, %v365_v58 }
 0x260   :  { %v374_v62 = vmul.f32 %v372_v60, %v366_v59 }
 0x262   :  { %v375_v63 = vpack.c.bf16 %v374_v62, %v373_v61 }
 0x264   :  { %904 = vmatmul.mubr.bf16.vlgmr.msra.gmra.mrb[4].mxu0 %v375_v63 }
 0x265   :  { %943 = vmatprep.mubr.msk.bf16.mxu0 %vm1190_vm0, %v1189_v0  ;;  %928 = vmatpush3.bf16.msra.mxu0 %v993_v7 }
 0x266   :  { %929 = vmatprep.subr.bf16.mxu0 %v1189_v0 }
 0x269   :  { %930 = vmatpush3.bf16.msra.mxu0 %v994_v8 }
 0x26a   :  { %931 = vmatprep.subr.bf16.mxu0 %v1189_v0 }
 0x26d   :  { %932 = vmatpush3.bf16.msra.mxu0 %v995_v27 }
 0x26e   :  { %933 = vmatprep.subr.bf16.mxu0 %v1189_v0 }
 0x271   :  { %934 = vmatpush3.bf16.msra.mxu0 %v996_v28 }
 0x272   :  { %935 = vmatprep.subr.bf16.mxu0 %v1189_v0 }
 0x275   :  { %936 = vmatpush3.bf16.msra.mxu0 %v997_v29 }
 0x276   :  { %937 = vmatprep.subr.bf16.mxu0 %v1189_v0 }
 0x279   :  { %938 = vmatpush3.bf16.msra.mxu0 %v998_v30 }
 0x27a   :  { %939 = vmatprep.subr.bf16.mxu0 %v1189_v0 }
 0x27d   :  { %940 = vmatpush3.bf16.msra.mxu0 %v999_v31 }
 0x27e   :  { %941 = vmatprep.subr.bf16.mxu0 %v1189_v0 }
 0x281   :  { %942 = vmatpush3.bf16.msra.mxu0 %v1000_v32 }
 0x337   :  { %v481_v10 = vpop.f32.mrb[4].mxu0 }
 0x338   :  { %v482_v11 = vadd.f32 %v775_v9, %v481_v10  ;;  %v905_v12 = vpop.f32.mrb[5].mxu0 }
 0x339   :  { %v484_v13 = vpop.f32.mrb[6].mxu0 }
 0x33a   :  { %v490_v14 = vmul.f32 0.70710677, %v482_v11  ;;  %v485_v15 = vadd.f32 %v775_v9, %v484_v13  ;;  %v906_v16 = vpop.f32.mrb[7].mxu0  ;;  %v488_v21 = vmul.f32 0.5, %v482_v11 }
 0x33c   :  { %1009 = verf.f32 %v490_v14  ;;  %v491_v17 = vmul.f32 0.70710677, %v485_v15  ;;  %v489_v22 = vmul.f32 0.5, %v485_v15 }
 0x33e   :  { %1011 = verf.f32 %v491_v17 }
 0x346   :  { %v1010_v18 = vpop.eup %1009 }
 0x347   :  { %v494_v19 = vadd.f32 1.0, %v1010_v18 }
 0x348   :  { %v1012_v20 = vpop.eup %1011 }
 0x349   :  { %v495_v23 = vadd.f32 1.0, %v1012_v20  ;;  %v496_v24 = vmul.f32 %v494_v19, %v488_v21 }
 0x34b   :  { %v497_v25 = vmul.f32 %v495_v23, %v489_v22 }
 0x34d   :  { %v498_v26 = vpack.c.bf16 %v497_v25, %v496_v24 }
 0x34f   :  { %924 = vmatmul.mubr.bf16.vlgmr.msra.gmra.mrb[4].mxu1 %v498_v26 }
 0x422   :  { %v604_v34 = vpop.f32.mrb[4].mxu1 }
 0x423   :  { %v605_v35 = vadd.f32 %v784_v33, %v604_v34  ;;  %v925_v36 = vpop.f32.mrb[5].mxu1 }
 0x424   :  { %v607_v37 = vpop.f32.mrb[6].mxu1 }
 0x425   :  { %v613_v38 = vmul.f32 0.70710677, %v605_v35  ;;  %v608_v39 = vadd.f32 %v784_v33, %v607_v37  ;;  %v926_v40 = vpop.f32.mrb[7].mxu1  ;;  %v611_v0 = vmul.f32 0.5, %v605_v35 }
 0x427   :  { %1013 = verf.f32 %v613_v38  ;;  %v614_v41 = vmul.f32 0.70710677, %v608_v39  ;;  %v612_v45 = vmul.f32 0.5, %v608_v39 }
 0x429   :  { %1015 = verf.f32 %v614_v41 }
 0x431   :  { %v1014_v42 = vpop.eup %1013 }
 0x432   :  { %v617_v43 = vadd.f32 1.0, %v1014_v42 }
 0x433   :  { %v1016_v44 = vpop.eup %1015 }
 0x434   :  { %v618_v46 = vadd.f32 1.0, %v1016_v44  ;;  %v619_v47 = vmul.f32 %v617_v43, %v611_v0 }
 0x436   :  { %v620_v48 = vmul.f32 %v618_v46, %v612_v45 }
 0x438   :  { %v621_v49 = vpack.c.bf16 %v620_v48, %v619_v47 }
 0x43a   :  { %944 = vmatmul.mubr.bf16.vlgmr.msra.gmra.mrb[8].mxu0 %v621_v49 }
 0x50d   :  { %v727_v51 = vpop.f32.mrb[8].mxu0 }
 0x50e   :  { %v728_v52 = vadd.f32 %v793_v50, %v727_v51  ;;  %v945_v53 = vpop.f32.mrb[9].mxu0 }
 0x50f   :  { %v730_v54 = vpop.f32.mrb[10].mxu0 }
 0x510   :  { %734 = vst [vmem:[#allocation13] sm:$0xff] %v728_v52  ;;  %v731_v55 = vadd.f32 %v793_v50, %v730_v54  ;;  %v946_v56 = vpop.f32.mrb[11].mxu0 }
 0x512   :  { %735 = vst [vmem:[#allocation13 + $0x8] sm:$0xff] %v731_v55 }
 0x513   :  { %1160 = shalt.err (!%p1157_p10)
}
 0x514   :  { %s1161_s21 = scalar_lea.hbm %s1453_s11, 256 }
 0x515   :  { %p1162_p11 = scmp.ne.s32.totalorder %s1453_s11, %s1161_s21  ;;  %p1165_p12 = scmp.lt.u32.totalorder %s1161_s21, %s1453_s11 }
 0x517   :  { %p1167_p13 = pnand %p1165_p12, %p1162_p11 }
 0x519   :  { %1170 = shalt.err (!%p1167_p13)
}
 0x51a   :  { %s1192_s1 = smov 128   ;;  %s1193_s18 = smov 8  }
 0x51b   :  { %747 = dma.vmem_to_hbm [thread:$0]  %s742_s5, 256, %s1453_s11, [#allocation4], %s1192_s1, %s1192_s1, %s1193_s18  }
 0x51c   :  { %1179 = dma.done.wait [#allocation4], 256  }
 0x51d   :  { %1180 = vsyncadd [#allocation4], 4294967040 }
 0x51e   :  { %751 = vsyncpa [#allocation3], 1 }
 0x51f   :  { %752 = vsyncpa [#allocation6], 1 }
 0x520   :  { %753 = vsyncpa [#allocation9], 1 }
 0x521   :  { %754 = vsyncpa [#allocation12], 1 }
 0x522   :  { %755 = vsyncpa [#allocation4], 1 }

// kernel: tpu_custom_call.1
= control target key start
LH: loop header
LB: loop body
LE: loop exit
PB: predicated region body
PF: predicated region fallthrough
CT: control target
= control target key end

     0   :  { %16 = vsyncpa [#allocation3], 0  ;;  %s1442_s0 = inlined_call_operand.hbm [shape: bf16[16,128], index: 0, kind: input, shape index: {}]   ;;  %s1443_s1 = inlined_call_operand.hbm [shape: bf16[128,128], index: 1, kind: input, shape index: {}]   ;;  %s1444_s2 = inlined_call_operand.vmem [shape: f32[1,128], index: 2, kind: input, shape index: {}]   ;;  %s1445_s3 = inlined_call_operand.hbm [shape: bf16[128,128], index: 3, kind: input, shape index: {}]   ;;  %s1446_s4 = inlined_call_operand.vmem [shape: f32[1,128], index: 4, kind: input, shape index: {}]   ;;  %s1447_s5 = inlined_call_operand.hbm [shape: bf16[128,128], index: 5, kind: input, shape index: {}]   ;;  %s1448_s6 = inlined_call_operand.vmem [shape: f32[1,128], index: 6, kind: input, shape index: {}]   ;;  %s1449_s7 = inlined_call_operand.hbm [shape: bf16[128,128], index: 7, kind: input, shape index: {}]   ;;  %s1450_s8 = inlined_call_operand.vmem [shape: f32[1,128], index: 8, kind: input, shape index: {}]   ;;  %s1451_s9 = inlined_call_operand.hbm [shape: bf16[128,128], index: 9, kind: input, shape index: {}]   ;;  %s1452_s10 = inlined_call_operand.vmem [shape: f32[1,128], index: 10, kind: input, shape index: {}]   ;;  %s1453_s11 = inlined_call_operand.hbm [shape: f32[16,128], index: 11, kind: output, shape index: {}]  }
   0x1   :  { %17 = vsyncpa [#allocation6], 0 }
   0x2   :  { %18 = vsyncpa [#allocation9], 0 }
   0x3   :  { %19 = vsyncpa [#allocation12], 0 }
   0x4   :  { %20 = vsyncpa [#allocation4], 0  ;;  %s1181_s17 = smov [#allocation5]   ;;  %s1182_s19 = smov [#allocation8]  }
   0x5   :  { %s38_s18 = sshll.u32 %s1181_s17, 4  ;;  %s66_s20 = sshll.u32 %s1182_s19, 4  ;;  %s39_s18 = int_to_ptr.vmem [resolvable:$true] %s38_s18  ;;  %s1254_s20 = int_to_ptr.vmem [resolvable:$true] %s66_s20 }
   0x6   :  { %s1017_s23 = scalar_lea.hbm %s1443_s1, 1024 }
   0x7   :  { %p1018_p0 = scmp.ne.s32.totalorder %s1443_s1, %s1017_s23  ;;  %p1021_p1 = scmp.lt.u32.totalorder %s1017_s23, %s1443_s1 }
   0x9   :  { %p1023_p2 = pnand %p1021_p1, %p1018_p0 }
   0xb   :  { %1026 = shalt.err (!%p1023_p2)
}
   0xc   :  { %s1027_s28 = scalar_lea.vmem %s39_s18, 1024  ;;  %p1032_p4 = scmp.lt.s32.totalorder %s39_s18, %s39_s18 }
   0xd   :  { %p1028_p3 = scmp.ne.s32.totalorder %s39_s18, %s1027_s28  ;;  %p1033_p5 = scmp.lt.s32.totalorder %s1027_s28, %s1027_s28 }
   0xf   :  { %p1034_p6 = por %p1033_p5, %p1032_p4 }
  0x11   :  { %p1035_p7 = pnand %p1034_p6, %p1028_p3 }
  0x13   :  { %1038 = shalt.err (!%p1035_p7)
}
  0x14   :  { %s1183_s29 = smov 64   ;;  %s1184_s30 = smov 4  }
  0x15   :  { %44 = dma.hbm_to_vmem [thread:$0]  %s1443_s1, 1024, %s39_s18, [#allocation6], %s1183_s29, %s1183_s29, %s1184_s30  }
  0x16   :  { %s1039_s16 = scalar_lea.hbm %s1447_s5, 1024 }
  0x17   :  { %p1040_p8 = scmp.ne.s32.totalorder %s1447_s5, %s1039_s16  ;;  %p1043_p9 = scmp.lt.u32.totalorder %s1039_s16, %s1447_s5 }
  0x19   :  { %p1045_p10 = pnand %p1043_p9, %p1040_p8 }
  0x1b   :  { %1048 = shalt.err (!%p1045_p10)
}
  0x1c   :  { %s1049_s23 = scalar_lea.vmem %s1254_s20, 1024  ;;  %p1054_p12 = scmp.lt.s32.totalorder %s1254_s20, %s1254_s20 }
  0x1d   :  { %p1050_p11 = scmp.ne.s32.totalorder %s1254_s20, %s1049_s23  ;;  %p1055_p13 = scmp.lt.s32.totalorder %s1049_s23, %s1049_s23 }
  0x1f   :  { %p1056_p0 = por %p1055_p13, %p1054_p12 }
  0x21   :  { %p1057_p1 = pnand %p1056_p0, %p1050_p11 }
  0x23   :  { %1060 = shalt.err (!%p1057_p1)
}
  0x24   :  { %72 = dma.hbm_to_vmem [thread:$0]  %s1447_s5, 1024, %s1254_s20, [#allocation9], %s1183_s29, %s1183_s29, %s1184_s30  }
  0x25   :  { %s1185_s24 = smov [#allocation2]   ;;  %s1186_s26 = smov [#allocation7]  }
  0x26   :  { %s26_s25 = sshll.u32 %s1185_s24, 4  ;;  %s52_s27 = sshll.u32 %s1186_s26, 4  ;;  %s27_s25 = int_to_ptr.vmem [resolvable:$true] %s26_s25  ;;  %s1291_s27 = int_to_ptr.vmem [resolvable:$true] %s52_s27 }
  0x27   :  { %s1061_s13 = scalar_lea.hbm %s1442_s0, 128 }
  0x28   :  { %p1062_p2 = scmp.ne.s32.totalorder %s1442_s0, %s1061_s13  ;;  %p1065_p3 = scmp.lt.u32.totalorder %s1061_s13, %s1442_s0 }
  0x2a   :  { %p1067_p4 = pnand %p1065_p3, %p1062_p2 }
  0x2c   :  { %1070 = shalt.err (!%p1067_p4)
}
  0x2d   :  { %s1071_s5 = scalar_lea.vmem %s27_s25, 128  ;;  %p1076_p6 = scmp.lt.s32.totalorder %s27_s25, %s27_s25 }
  0x2e   :  { %p1072_p5 = scmp.ne.s32.totalorder %s27_s25, %s1071_s5  ;;  %p1077_p7 = scmp.lt.s32.totalorder %s1071_s5, %s1071_s5 }
  0x30   :  { %p1078_p8 = por %p1077_p7, %p1076_p6 }
  0x32   :  { %p1079_p9 = pnand %p1078_p8, %p1072_p5 }
  0x34   :  { %1082 = shalt.err (!%p1079_p9)
}
  0x35   :  { %32 = dma.hbm_to_vmem [thread:$0]  %s1442_s0, 128, %s27_s25, [#allocation3], %s1183_s29, %s1183_s29, %s1184_s30  }
  0x36   :  { %s1083_s23 = scalar_lea.hbm %s1445_s3, 1024 }
  0x37   :  { %p1084_p10 = scmp.ne.s32.totalorder %s1445_s3, %s1083_s23  ;;  %p1087_p11 = scmp.lt.u32.totalorder %s1083_s23, %s1445_s3 }
  0x39   :  { %p1089_p12 = pnand %p1087_p11, %p1084_p10 }
  0x3b   :  { %1092 = shalt.err (!%p1089_p12)
}
  0x3c   :  { %s1093_s28 = scalar_lea.vmem %s1291_s27, 1024  ;;  %p1098_p0 = scmp.lt.s32.totalorder %s1291_s27, %s1291_s27 }
  0x3d   :  { %p1094_p13 = scmp.ne.s32.totalorder %s1291_s27, %s1093_s28  ;;  %p1099_p1 = scmp.lt.s32.totalorder %s1093_s28, %s1093_s28 }
  0x3f   :  { %p1100_p2 = por %p1099_p1, %p1098_p0 }
  0x41   :  { %p1101_p3 = pnand %p1100_p2, %p1094_p13 }
  0x43   :  { %1104 = shalt.err (!%p1101_p3)
}
  0x44   :  { %58 = dma.hbm_to_vmem [thread:$0]  %s1445_s3, 1024, %s1291_s27, [#allocation6], %s1183_s29, %s1183_s29, %s1184_s30  }
  0x45   :  { %s1187_s12 = smov [#allocation10]   ;;  %s1188_s14 = smov [#allocation11]  }
  0x46   :  { %s80_s13 = sshll.u32 %s1187_s12, 4  ;;  %s94_s15 = sshll.u32 %s1188_s14, 4  ;;  %s81_s13 = int_to_ptr.vmem [resolvable:$true] %s80_s13  ;;  %s1328_s15 = int_to_ptr.vmem [resolvable:$true] %s94_s15 }
  0x47   :  { %s1105_s5 = scalar_lea.hbm %s1449_s7, 1024 }
  0x48   :  { %p1106_p4 = scmp.ne.s32.totalorder %s1449_s7, %s1105_s5  ;;  %p1109_p5 = scmp.lt.u32.totalorder %s1105_s5, %s1449_s7 }
  0x4a   :  { %p1111_p6 = pnand %p1109_p5, %p1106_p4 }
  0x4c   :  { %1114 = shalt.err (!%p1111_p6)
}
  0x4d   :  { %s1115_s3 = scalar_lea.vmem %s81_s13, 1024  ;;  %p1120_p8 = scmp.lt.s32.totalorder %s81_s13, %s81_s13 }
  0x4e   :  { %p1116_p7 = scmp.ne.s32.totalorder %s81_s13, %s1115_s3  ;;  %p1121_p9 = scmp.lt.s32.totalorder %s1115_s3, %s1115_s3 }
  0x50   :  { %p1122_p10 = por %p1121_p9, %p1120_p8 }
  0x52   :  { %p1123_p11 = pnand %p1122_p10, %p1116_p7 }
  0x54   :  { %1126 = shalt.err (!%p1123_p11)
}
  0x55   :  { %86 = dma.hbm_to_vmem [thread:$0]  %s1449_s7, 1024, %s81_s13, [#allocation9], %s1183_s29, %s1183_s29, %s1184_s30  }
  0x56   :  { %s1127_s24 = scalar_lea.hbm %s1451_s9, 1024 }
  0x57   :  { %p1128_p12 = scmp.ne.s32.totalorder %s1451_s9, %s1127_s24  ;;  %p1131_p13 = scmp.lt.u32.totalorder %s1127_s24, %s1451_s9 }
  0x59   :  { %p1133_p0 = pnand %p1131_p13, %p1128_p12 }
  0x5b   :  { %1136 = shalt.err (!%p1133_p0)
}
  0x5c   :  { %s1137_s12 = scalar_lea.vmem %s1328_s15, 1024  ;;  %p1142_p2 = scmp.lt.s32.totalorder %s1328_s15, %s1328_s15 }
  0x5d   :  { %p1138_p1 = scmp.ne.s32.totalorder %s1328_s15, %s1137_s12  ;;  %p1143_p3 = scmp.lt.s32.totalorder %s1137_s12, %s1137_s12 }
  0x5f   :  { %p1144_p4 = por %p1143_p3, %p1142_p2 }
  0x61   :  { %p1145_p5 = pnand %p1144_p4, %p1138_p1 }
  0x63   :  { %1148 = shalt.err (!%p1145_p5)
}
  0x64   :  { %100 = dma.hbm_to_vmem [thread:$0]  %s1451_s9, 1024, %s1328_s15, [#allocation12], %s1183_s29, %s1183_s29, %s1184_s30  }
  0x65   :  { %1171 = dma.done.wait [#allocation3], 128  }
  0x66   :  { %1172 = vsyncadd [#allocation3], 4294967168 }
  0x67   :  { %1173 = dma.done.wait [#allocation6], 2048  }
  0x68   :  { %1174 = vsyncadd [#allocation6], 4294965248 }
  0x69   :  { %1175 = dma.done.wait [#allocation9], 2048  }
  0x6a   :  { %1176 = vsyncadd [#allocation9], 4294965248 }
  0x6b   :  { %1177 = dma.done.wait [#allocation12], 1024  }
  0x6c   :  { %1178 = vsyncadd [#allocation12], 4294966272  ;;  %v1189_v0 = vmov 0.0   ;;  %vm1190_vm0 = vmmov 0   ;;  %v960_v1 = vld [vmem:[#allocation5] sm:$0xff]   ;;  %v961_v2 = vld [vmem:[#allocation5 + $0x8] sm:$0xff]  }
  0x6d   :  { %847 = vmatprep.subr.bf16.mxu0 %v1189_v0  ;;  %863 = vmatprep.mubr.msk.bf16.mxu0 %vm1190_vm0, %v1189_v0  ;;  %v962_v3 = vld [vmem:[#allocation5 + $0x10] sm:$0xff]   ;;  %v969_v4 = vld [vmem:[#allocation7] sm:$0xff]   ;;  %v963_v5 = vld [vmem:[#allocation5 + $0x18] sm:$0xff]   ;;  %s1191_s17 = smov [#allocation13]  }
  0x6e   :  { %867 = vmatprep.subr.bf16.mxu1 %v1189_v0  ;;  %883 = vmatprep.mubr.msk.bf16.mxu1 %vm1190_vm0, %v1189_v0  ;;  %v970_v6 = vld [vmem:[#allocation7 + $0x8] sm:$0xff]   ;;  %v964_v7 = vld [vmem:[#allocation5 + $0x20] sm:$0xff]   ;;  %v966_v9 = vld [vmem:[#allocation5 + $0x30] sm:$0xff]   ;;  %s741_s5 = sshll.u32 %s1191_s17, 4  ;;  %s742_s5 = int_to_ptr.vmem [resolvable:$true] %s741_s5 }
  0x6f   :  { %848 = vmatpush3.bf16.msra.mxu0 %v960_v1  ;;  %868 = vmatpush3.bf16.msra.mxu1 %v969_v4  ;;  %v965_v8 = vld [vmem:[#allocation5 + $0x28] sm:$0xff]   ;;  %v967_v10 = vld [vmem:[#allocation5 + $0x38] sm:$0xff]   ;;  %v971_v12 = vld [vmem:[#allocation7 + $0x10] sm:$0xff]   ;;  %s1149_s20 = scalar_lea.vmem %s742_s5, 256  ;;  %p1154_p7 = scmp.lt.s32.totalorder %s742_s5, %s742_s5 }
  0x70   :  { %849 = vmatprep.subr.bf16.mxu0 %v1189_v0  ;;  %869 = vmatprep.subr.bf16.mxu1 %v1189_v0  ;;  %v968_v11 = vld [vmem:[#allocation2] sm:$0xff]   ;;  %v973_v14 = vld [vmem:[#allocation7 + $0x20] sm:$0xff]   ;;  %v974_v15 = vld [vmem:[#allocation7 + $0x28] sm:$0xff]   ;;  %p1150_p6 = scmp.ne.s32.totalorder %s742_s5, %s1149_s20  ;;  %p1155_p8 = scmp.lt.s32.totalorder %s1149_s20, %s1149_s20 }
  0x71   :  { %v972_v13 = vld [vmem:[#allocation7 + $0x18] sm:$0xff]   ;;  %v975_v16 = vld [vmem:[#allocation7 + $0x30] sm:$0xff]   ;;  %v977_v18 = vld [vmem:[#allocation8] sm:$0xff]  }
  0x72   :  { %v976_v17 = vld [vmem:[#allocation7 + $0x38] sm:$0xff]   ;;  %v978_v19 = vld [vmem:[#allocation8 + $0x8] sm:$0xff]   ;;  %v979_v38 = vld [vmem:[#allocation8 + $0x10] sm:$0xff]   ;;  %p1156_p9 = por %p1155_p8, %p1154_p7 }
  0x73   :  { %850 = vmatpush3.bf16.msra.mxu0 %v961_v2  ;;  %870 = vmatpush3.bf16.msra.mxu1 %v970_v6  ;;  %v756_v20 = vld [vmem:[%s1444_s2] ss:$0 sm:$0xff]  ;;  %v981_v40 = vld [vmem:[#allocation8 + $0x20] sm:$0xff]   ;;  %v982_v41 = vld [vmem:[#allocation8 + $0x28] sm:$0xff]  }
  0x74   :  { %851 = vmatprep.subr.bf16.mxu0 %v1189_v0  ;;  %871 = vmatprep.subr.bf16.mxu1 %v1189_v0  ;;  %v980_v39 = vld [vmem:[#allocation8 + $0x18] sm:$0xff]   ;;  %v983_v42 = vld [vmem:[#allocation8 + $0x30] sm:$0xff]   ;;  %v985_v44 = vld [vmem:[#allocation10] sm:$0xff]   ;;  %p1157_p10 = pnand %p1156_p9, %p1150_p6 }
  0x75   :  { %v984_v43 = vld [vmem:[#allocation8 + $0x38] sm:$0xff]   ;;  %v986_v45 = vld [vmem:[#allocation10 + $0x8] sm:$0xff]   ;;  %v987_v1 = vld [vmem:[#allocation10 + $0x10] sm:$0xff]  }
  0x76   :  { %v766_v46 = vld [vmem:[%s1446_s4] ss:$0 sm:$0xff]  ;;  %v990_v4 = vld [vmem:[#allocation10 + $0x28] sm:$0xff]  }
  0x77   :  { %852 = vmatpush3.bf16.msra.mxu0 %v962_v3  ;;  %872 = vmatpush3.bf16.msra.mxu1 %v971_v12  ;;  %v988_v2 = vld [vmem:[#allocation10 + $0x18] sm:$0xff]   ;;  %v989_v3 = vld [vmem:[#allocation10 + $0x20] sm:$0xff]  }
  0x78   :  { %853 = vmatprep.subr.bf16.mxu0 %v1189_v0  ;;  %873 = vmatprep.subr.bf16.mxu1 %v1189_v0  ;;  %v992_v6 = vld [vmem:[#allocation10 + $0x38] sm:$0xff]  }
  0x7b   :  { %854 = vmatpush3.bf16.msra.mxu0 %v963_v5  ;;  %874 = vmatpush3.bf16.msra.mxu1 %v972_v13  ;;  %v991_v5 = vld [vmem:[#allocation10 + $0x30] sm:$0xff]  }
  0x7c   :  { %855 = vmatprep.subr.bf16.mxu0 %v1189_v0  ;;  %875 = vmatprep.subr.bf16.mxu1 %v1189_v0 }
  0x7f   :  { %856 = vmatpush3.bf16.msra.mxu0 %v964_v7  ;;  %876 = vmatpush3.bf16.msra.mxu1 %v973_v14  ;;  %v993_v7 = vld [vmem:[#allocation11] sm:$0xff]  }
  0x80   :  { %857 = vmatprep.subr.bf16.mxu0 %v1189_v0  ;;  %877 = vmatprep.subr.bf16.mxu1 %v1189_v0 }
  0x83   :  { %858 = vmatpush3.bf16.msra.mxu0 %v965_v8  ;;  %878 = vmatpush3.bf16.msra.mxu1 %v974_v15  ;;  %v994_v8 = vld [vmem:[#allocation11 + $0x8] sm:$0xff]  }
  0x84   :  { %859 = vmatprep.subr.bf16.mxu0 %v1189_v0  ;;  %879 = vmatprep.subr.bf16.mxu1 %v1189_v0 }
  0x87   :  { %860 = vmatpush3.bf16.msra.mxu0 %v966_v9  ;;  %880 = vmatpush3.bf16.msra.mxu1 %v975_v16  ;;  %v775_v9 = vld [vmem:[%s1448_s6] ss:$0 sm:$0xff] }
  0x88   :  { %861 = vmatprep.subr.bf16.mxu0 %v1189_v0  ;;  %881 = vmatprep.subr.bf16.mxu1 %v1189_v0 }
  0x8b   :  { %862 = vmatpush3.bf16.msra.mxu0 %v967_v10  ;;  %882 = vmatpush3.bf16.msra.mxu1 %v976_v17 }
  0x8c   :  { %887 = vmatprep.subr.bf16.mxu0 %v1189_v0  ;;  %907 = vmatprep.subr.bf16.mxu1 %v1189_v0 }
  0x8e   :  { %864 = vmatmul.mubr.bf16.vlgmr.msra.gmra.mrb[0].mxu0 %v968_v11 }
  0x8f   :  { %903 = vmatprep.mubr.msk.bf16.mxu0 %vm1190_vm0, %v1189_v0  ;;  %888 = vmatpush3.bf16.msra.mxu0 %v977_v18 }
  0x90   :  { %889 = vmatprep.subr.bf16.mxu0 %v1189_v0 }
  0x93   :  { %890 = vmatpush3.bf16.msra.mxu0 %v978_v19 }
  0x94   :  { %891 = vmatprep.subr.bf16.mxu0 %v1189_v0 }
  0x97   :  { %892 = vmatpush3.bf16.msra.mxu0 %v979_v38 }
  0x98   :  { %893 = vmatprep.subr.bf16.mxu0 %v1189_v0 }
  0x9b   :  { %894 = vmatpush3.bf16.msra.mxu0 %v980_v39 }
  0x9c   :  { %895 = vmatprep.subr.bf16.mxu0 %v1189_v0 }
  0x9f   :  { %896 = vmatpush3.bf16.msra.mxu0 %v981_v40 }
  0xa0   :  { %897 = vmatprep.subr.bf16.mxu0 %v1189_v0 }
  0xa3   :  { %898 = vmatpush3.bf16.msra.mxu0 %v982_v41 }
  0xa4   :  { %899 = vmatprep.subr.bf16.mxu0 %v1189_v0 }
  0xa7   :  { %900 = vmatpush3.bf16.msra.mxu0 %v983_v42 }
  0xa8   :  { %901 = vmatprep.subr.bf16.mxu0 %v1189_v0 }
  0xab   :  { %902 = vmatpush3.bf16.msra.mxu0 %v984_v43 }
  0xac   :  { %927 = vmatprep.subr.bf16.mxu0 %v1189_v0 }
 0x161   :  { %v235_v21 = vpop.f32.mrb[0].mxu0 }
 0x162   :  { %v236_v22 = vadd.f32 %v756_v20, %v235_v21  ;;  %v865_v23 = vpop.f32.mrb[1].mxu0 }
 0x163   :  { %v238_v24 = vpop.f32.mrb[2].mxu0 }
 0x164   :  { %v244_v25 = vmul.f32 0.70710677, %v236_v22  ;;  %v239_v26 = vadd.f32 %v756_v20, %v238_v24  ;;  %v866_v27 = vpop.f32.mrb[3].mxu0  ;;  %v242_v32 = vmul.f32 0.5, %v236_v22 }
 0x165   :  { %v995_v27 = vld [vmem:[#allocation11 + $0x10] sm:$0xff]  }
 0x166   :  { %1001 = verf.f32 %v244_v25  ;;  %v245_v28 = vmul.f32 0.70710677, %v239_v26  ;;  %v243_v33 = vmul.f32 0.5, %v239_v26 }
 0x168   :  { %1003 = verf.f32 %v245_v28  ;;  %v996_v28 = vld [vmem:[#allocation11 + $0x18] sm:$0xff]  }
 0x170   :  { %v1002_v29 = vpop.eup %1001 }
 0x171   :  { %v248_v30 = vadd.f32 1.0, %v1002_v29  ;;  %v997_v29 = vld [vmem:[#allocation11 + $0x20] sm:$0xff]  }
 0x172   :  { %v1004_v31 = vpop.eup %1003 }
 0x173   :  { %v249_v34 = vadd.f32 1.0, %v1004_v31  ;;  %v250_v35 = vmul.f32 %v248_v30, %v242_v32  ;;  %v998_v30 = vld [vmem:[#allocation11 + $0x28] sm:$0xff]   ;;  %v999_v31 = vld [vmem:[#allocation11 + $0x30] sm:$0xff]   ;;  %v1000_v32 = vld [vmem:[#allocation11 + $0x38] sm:$0xff]  }
 0x175   :  { %v251_v36 = vmul.f32 %v249_v34, %v243_v33  ;;  %v784_v33 = vld [vmem:[%s1450_s8] ss:$0 sm:$0xff] }
 0x177   :  { %v252_v37 = vpack.c.bf16 %v251_v36, %v250_v35 }
 0x179   :  { %884 = vmatmul.mubr.bf16.vlgmr.msra.gmra.mrb[0].mxu1 %v252_v37 }
 0x17a   :  { %923 = vmatprep.mubr.msk.bf16.mxu1 %vm1190_vm0, %v1189_v0  ;;  %908 = vmatpush3.bf16.msra.mxu1 %v985_v44 }
 0x17b   :  { %909 = vmatprep.subr.bf16.mxu1 %v1189_v0 }
 0x17e   :  { %910 = vmatpush3.bf16.msra.mxu1 %v986_v45 }
 0x17f   :  { %911 = vmatprep.subr.bf16.mxu1 %v1189_v0 }
 0x182   :  { %912 = vmatpush3.bf16.msra.mxu1 %v987_v1 }
 0x183   :  { %913 = vmatprep.subr.bf16.mxu1 %v1189_v0 }
 0x186   :  { %914 = vmatpush3.bf16.msra.mxu1 %v988_v2 }
 0x187   :  { %915 = vmatprep.subr.bf16.mxu1 %v1189_v0 }
 0x18a   :  { %916 = vmatpush3.bf16.msra.mxu1 %v989_v3 }
 0x18b   :  { %917 = vmatprep.subr.bf16.mxu1 %v1189_v0 }
 0x18e   :  { %918 = vmatpush3.bf16.msra.mxu1 %v990_v4 }
 0x18f   :  { %919 = vmatprep.subr.bf16.mxu1 %v1189_v0 }
 0x192   :  { %920 = vmatpush3.bf16.msra.mxu1 %v991_v5 }
 0x193   :  { %921 = vmatprep.subr.bf16.mxu1 %v1189_v0 }
 0x196   :  { %922 = vmatpush3.bf16.msra.mxu1 %v992_v6 }
 0x24c   :  { %v358_v47 = vpop.f32.mrb[0].mxu1 }
 0x24d   :  { %v359_v48 = vadd.f32 %v766_v46, %v358_v47  ;;  %v885_v49 = vpop.f32.mrb[1].mxu1 }
 0x24e   :  { %v361_v50 = vpop.f32.mrb[2].mxu1 }
 0x24f   :  { %v367_v51 = vmul.f32 0.70710677, %v359_v48  ;;  %v362_v52 = vadd.f32 %v766_v46, %v361_v50  ;;  %v886_v53 = vpop.f32.mrb[3].mxu1  ;;  %v365_v58 = vmul.f32 0.5, %v359_v48  ;;  %v793_v50 = vld [vmem:[%s1452_s10] ss:$0 sm:$0xff] }
 0x251   :  { %1005 = verf.f32 %v367_v51  ;;  %v368_v54 = vmul.f32 0.70710677, %v362_v52  ;;  %v366_v59 = vmul.f32 0.5, %v362_v52 }
 0x253   :  { %1007 = verf.f32 %v368_v54 }
 0x25b   :  { %v1006_v55 = vpop.eup %1005 }
 0x25c   :  { %v371_v56 = vadd.f32 1.0, %v1006_v55 }
 0x25d   :  { %v1008_v57 = vpop.eup %1007 }
 0x25e   :  { %v372_v60 = vadd.f32 1.0, %v1008_v57  ;;  %v373_v61 = vmul.f32 %v371_v56, %v365_v58 }
 0x260   :  { %v374_v62 = vmul.f32 %v372_v60, %v366_v59 }
 0x262   :  { %v375_v63 = vpack.c.bf16 %v374_v62, %v373_v61 }
 0x264   :  { %904 = vmatmul.mubr.bf16.vlgmr.msra.gmra.mrb[4].mxu0 %v375_v63 }
 0x265   :  { %943 = vmatprep.mubr.msk.bf16.mxu0 %vm1190_vm0, %v1189_v0  ;;  %928 = vmatpush3.bf16.msra.mxu0 %v993_v7 }
 0x266   :  { %929 = vmatprep.subr.bf16.mxu0 %v1189_v0 }
 0x269   :  { %930 = vmatpush3.bf16.msra.mxu0 %v994_v8 }
 0x26a   :  { %931 = vmatprep.subr.bf16.mxu0 %v1189_v0 }
 0x26d   :  { %932 = vmatpush3.bf16.msra.mxu0 %v995_v27 }
 0x26e   :  { %933 = vmatprep.subr.bf16.mxu0 %v1189_v0 }
 0x271   :  { %934 = vmatpush3.bf16.msra.mxu0 %v996_v28 }
 0x272   :  { %935 = vmatprep.subr.bf16.mxu0 %v1189_v0 }
 0x275   :  { %936 = vmatpush3.bf16.msra.mxu0 %v997_v29 }
 0x276   :  { %937 = vmatprep.subr.bf16.mxu0 %v1189_v0 }
 0x279   :  { %938 = vmatpush3.bf16.msra.mxu0 %v998_v30 }
 0x27a   :  { %939 = vmatprep.subr.bf16.mxu0 %v1189_v0 }
 0x27d   :  { %940 = vmatpush3.bf16.msra.mxu0 %v999_v31 }
 0x27e   :  { %941 = vmatprep.subr.bf16.mxu0 %v1189_v0 }
 0x281   :  { %942 = vmatpush3.bf16.msra.mxu0 %v1000_v32 }
 0x337   :  { %v481_v10 = vpop.f32.mrb[4].mxu0 }
 0x338   :  { %v482_v11 = vadd.f32 %v775_v9, %v481_v10  ;;  %v905_v12 = vpop.f32.mrb[5].mxu0 }
 0x339   :  { %v484_v13 = vpop.f32.mrb[6].mxu0 }
 0x33a   :  { %v490_v14 = vmul.f32 0.70710677, %v482_v11  ;;  %v485_v15 = vadd.f32 %v775_v9, %v484_v13  ;;  %v906_v16 = vpop.f32.mrb[7].mxu0  ;;  %v488_v21 = vmul.f32 0.5, %v482_v11 }
 0x33c   :  { %1009 = verf.f32 %v490_v14  ;;  %v491_v17 = vmul.f32 0.70710677, %v485_v15  ;;  %v489_v22 = vmul.f32 0.5, %v485_v15 }
 0x33e   :  { %1011 = verf.f32 %v491_v17 }
 0x346   :  { %v1010_v18 = vpop.eup %1009 }
 0x347   :  { %v494_v19 = vadd.f32 1.0, %v1010_v18 }
 0x348   :  { %v1012_v20 = vpop.eup %1011 }
 0x349   :  { %v495_v23 = vadd.f32 1.0, %v1012_v20  ;;  %v496_v24 = vmul.f32 %v494_v19, %v488_v21 }
 0x34b   :  { %v497_v25 = vmul.f32 %v495_v23, %v489_v22 }
 0x34d   :  { %v498_v26 = vpack.c.bf16 %v497_v25, %v496_v24 }
 0x34f   :  { %924 = vmatmul.mubr.bf16.vlgmr.msra.gmra.mrb[4].mxu1 %v498_v26 }
 0x422   :  { %v604_v34 = vpop.f32.mrb[4].mxu1 }
 0x423   :  { %v605_v35 = vadd.f32 %v784_v33, %v604_v34  ;;  %v925_v36 = vpop.f32.mrb[5].mxu1 }
 0x424   :  { %v607_v37 = vpop.f32.mrb[6].mxu1 }
 0x425   :  { %v613_v38 = vmul.f32 0.70710677, %v605_v35  ;;  %v608_v39 = vadd.f32 %v784_v33, %v607_v37  ;;  %v926_v40 = vpop.f32.mrb[7].mxu1  ;;  %v611_v0 = vmul.f32 0.5, %v605_v35 }
 0x427   :  { %1013 = verf.f32 %v613_v38  ;;  %v614_v41 = vmul.f32 0.70710677, %v608_v39  ;;  %v612_v45 = vmul.f32 0.5, %v608_v39 }
 0x429   :  { %1015 = verf.f32 %v614_v41 }
 0x431   :  { %v1014_v42 = vpop.eup %1013 }
 0x432   :  { %v617_v43 = vadd.f32 1.0, %v1014_v42 }
 0x433   :  { %v1016_v44 = vpop.eup %1015 }
 0x434   :  { %v618_v46 = vadd.f32 1.0, %v1016_v44  ;;  %v619_v47 = vmul.f32 %v617_v43, %v611_v0 }
 0x436   :  { %v620_v48 = vmul.f32 %v618_v46, %v612_v45 }
 0x438   :  { %v621_v49 = vpack.c.bf16 %v620_v48, %v619_v47 }
 0x43a   :  { %944 = vmatmul.mubr.bf16.vlgmr.msra.gmra.mrb[8].mxu0 %v621_v49 }
 0x50d   :  { %v727_v51 = vpop.f32.mrb[8].mxu0 }
 0x50e   :  { %v728_v52 = vadd.f32 %v793_v50, %v727_v51  ;;  %v945_v53 = vpop.f32.mrb[9].mxu0 }
 0x50f   :  { %v730_v54 = vpop.f32.mrb[10].mxu0 }
 0x510   :  { %734 = vst [vmem:[#allocation13] sm:$0xff] %v728_v52  ;;  %v731_v55 = vadd.f32 %v793_v50, %v730_v54  ;;  %v946_v56 = vpop.f32.mrb[11].mxu0 }
 0x512   :  { %735 = vst [vmem:[#allocation13 + $0x8] sm:$0xff] %v731_v55 }
 0x513   :  { %1160 = shalt.err (!%p1157_p10)
}
 0x514   :  { %s1161_s21 = scalar_lea.hbm %s1453_s11, 256 }
 0x515   :  { %p1162_p11 = scmp.ne.s32.totalorder %s1453_s11, %s1161_s21  ;;  %p1165_p12 = scmp.lt.u32.totalorder %s1161_s21, %s1453_s11 }
 0x517   :  { %p1167_p13 = pnand %p1165_p12, %p1162_p11 }
 0x519   :  { %1170 = shalt.err (!%p1167_p13)
}
 0x51a   :  { %s1192_s1 = smov 128   ;;  %s1193_s18 = smov 8  }
 0x51b   :  { %747 = dma.vmem_to_hbm [thread:$0]  %s742_s5, 256, %s1453_s11, [#allocation4], %s1192_s1, %s1192_s1, %s1193_s18  }
 0x51c   :  { %1179 = dma.done.wait [#allocation4], 256  }
 0x51d   :  { %1180 = vsyncadd [#allocation4], 4294967040 }
 0x51e   :  { %751 = vsyncpa [#allocation3], 1 }
 0x51f   :  { %752 = vsyncpa [#allocation6], 1 }
 0x520   :  { %753 = vsyncpa [#allocation9], 1 }
 0x521   :  { %754 = vsyncpa [#allocation12], 1 }
 0x522   :  { %755 = vsyncpa [#allocation4], 1 }

</bundles_post_ra>
